<compile_context>
chip_gen: v7x
topology: tpu7x:2x2x1
jax: 0.10.0
libtpu: 0.0.40
codegen_flags: <defaults>
</compile_context>

<pallas_src>
import functools

import jax
import jax.numpy as jnp
import numpy as np
from jax import lax
from jax.experimental import pallas as pl
from jax.experimental.pallas import tpu as pltpu


# ----------------------------------------------------------------------------
# Fused Pallas kernel
# ----------------------------------------------------------------------------
def _encoder_kernel(ipb, x_ref, m1, b1, m2, b2, m3, b3, wfc, bfc,
                    o_ref, pool, feat):
    """Full forward for `ipb` images whose rows are stacked along the M dimension.

    x_ref : (ipb*H, W) input rows (single input channel), image-major.
    m*    : (3*K, 2*N) banded conv matrices (ky taps stacked along K; even|odd pooled
            output columns stacked along N), K = W_s*Cin_s, N = (W_s//2)*Cout_s.
    b*    : (1, N) channel bias tiled along pooled columns.
    wfc   : (H3*W3*C3, code) fc1 weight in [h, w, c] feature order; bfc: (1, code).
    pool  : (ipb*H, Nmax) staging scratch for the H-pool row compaction.
    feat  : (ipb, H3*W3*C3) staging scratch for the per-image flatten.
    """

    def conv_relu_pool(p, m_ref, bias_ref):
        R, K = p.shape                         # R = ipb * H_s, K = W_s * Cin_s
        Himg = R // ipb                        # per-image height at this stage
        N = m_ref.shape[1] // 2
        # ky = 0 / 2 taps as in-register row shifts with per-image zero borders
        # (the rolls run on the otherwise idle XLU slot; no padded scratch buffer).
        row = lax.broadcasted_iota(jnp.int32, (R, K), 0) % Himg
        top = jnp.where(row == 0, 0.0, pltpu.roll(p, shift=1, axis=0))
        bot = jnp.where(row == Himg - 1, 0.0, pltpu.roll(p, shift=R - 1, axis=0))
        operand = jnp.concatenate([top, p, bot], axis=-1)        # (R, 3K)
        # 3x3 conv + the W-direction half of the 2x2 max-pool as ONE matmul.
        out = jnp.dot(operand, m_ref[...], preferred_element_type=jnp.float32)
        m = jnp.maximum(out[:, :N], out[:, N:])                  # pool along W
        # Pairwise row max in-register; only the even-row compaction uses the scratch.
        q = jnp.maximum(m, pltpu.roll(m, shift=R - 1, axis=0))   # q[r]=max(m[r],m[r+1])
        pool[0:R, 0:N] = q
        ph = pool[pl.ds(0, R // 2, 2), 0:N]                      # keep even rows
        return jnp.maximum(ph + bias_ref[...], 0.0)              # bias + ReLU post-pool

    p = x_ref[...]                             # (ipb*H, W), single input channel
    p = conv_relu_pool(p, m1, b1)              # (ipb*H/2, (W/2)*cs)
    p = conv_relu_pool(p, m2, b2)              # (ipb*H/4, (W/4)*2cs)
    p = conv_relu_pool(p, m3, b3)              # (ipb*H/8, (W/8)*4cs)

    # Flatten per image (torch NCHW order baked into wfc) and fc1 as one K=512 dot.
    H3 = p.shape[0] // ipb
    F = p.shape[1]
    for bi in range(ipb):
        for h in range(H3):
            r = bi * H3 + h
            feat[bi:bi + 1, h * F:(h + 1) * F] = p[r:r + 1, :]
    res = jnp.dot(feat[...], wfc[...], preferred_element_type=jnp.float32) + bfc[...]
    o_ref[:, 0, :] = res.astype(o_ref.dtype)


# ----------------------------------------------------------------------------
# Pallas wrapper
# ----------------------------------------------------------------------------
def _encoder_pallas(x_rows, prep, B, H, W, ipb):
    m1, b1, m2, b2, m3, b3, wfc, bfc = prep
    code = bfc.shape[-1]
    consts = [m1, b1, m2, b2, m3, b3, wfc, bfc]

    def const_spec(a):
        nd = a.ndim
        return pl.BlockSpec(a.shape, lambda i, _nd=nd: (0,) * _nd)

    npool = max(b1.shape[-1], b2.shape[-1], b3.shape[-1])
    out = pl.pallas_call(
        functools.partial(_encoder_kernel, ipb),
        out_shape=jax.ShapeDtypeStruct((B, 1, code), jnp.float32),
        grid_spec=pltpu.PrefetchScalarGridSpec(
            num_scalar_prefetch=0,
            grid=(B // ipb,),
            in_specs=[pl.BlockSpec((ipb * H, W), lambda i: (i, 0))]
                     + [const_spec(a) for a in consts],
            out_specs=pl.BlockSpec((ipb, 1, code), lambda i: (i, 0, 0)),
            scratch_shapes=[
                pltpu.VMEM((ipb * H, npool), jnp.float32),      # H-pool compaction
                pltpu.VMEM((ipb, wfc.shape[0]), jnp.float32),   # flattened features
            ],
        ),
        compiler_params=pltpu.CompilerParams(
            dimension_semantics=("parallel",)),
    )(x_rows, *consts)
    return out.reshape(B, code)


@functools.partial(jax.jit, static_argnums=(2,))
def extensible_encoder_forward(x_nchw, prep, images_per_block=1):
    """Forward pass.  x is PyTorch-style NCHW with 1 input channel."""
    B, _, H, W = x_nchw.shape
    x_rows = x_nchw.reshape(B * H, W).astype(jnp.float32)
    return _encoder_pallas(x_rows, prep, B, H, W, images_per_block)


def _images_per_block(batch):
    """Batch-folding policy.

    Single-TensorCore chips (v5e / v6e): fold the whole batch into the matmul M
    dimension (grid becomes a single step).  Multi-TC parts (v7x, v4/v5p megacore):
    one image per grid step so the "parallel" batch axis is sharded across cores.
    Both choices are numerically identical; this only affects performance.
    """
    try:
        kind = jax.devices()[0].device_kind.lower()
    except Exception:
        return 1
    single_tc = any(t in kind for t in
                    ("v5 lite", "v5e", "v5lite", "v6 lite", "v6e", "v6lite"))
    return batch if single_tc else 1


# ----------------------------------------------------------------------------
# Host-side (one-time) weight preparation -- outside the jitted per-call path
# ----------------------------------------------------------------------------
def _build_stage_mat(w_oihw, b, W):
    """Banded matrix for a 3x3 conv (pad=1) with ky folded into K and the
    W-direction half of the 2x2 max-pool (even|odd output columns) folded into N.

    Returns Mfull of shape (3*W*Cin, 2*(W//2)*Cout) and the tiled bias (1, (W//2)*Cout).
    Row block t (tap ky=t) multiplies the input row shifted by t-1; columns [0, N)
    produce the EVEN conv output columns, [N, 2N) the ODD ones (channel-minor,
    pooled-column major).  Left/right zero padding is folded in by omitting
    out-of-range taps.
    """
    w = np.asarray(w_oihw, np.float32)           # (Cout, Cin, 3, 3)
    Cout, Cin = w.shape[0], w.shape[1]
    K = W * Cin
    Wp = W // 2
    N = Wp * Cout
    M = np.zeros((3, K, 2 * N), np.float32)
    for ky in range(3):
        for kx in range(3):
            blk = w[:, :, ky, kx].T              # (Cin, Cout)
            for w2 in range(Wp):
                we = 2 * w2 + kx - 1             # input col feeding even output 2*w2
                wo = 2 * w2 + kx                 # input col feeding odd output 2*w2+1
                if 0 <= we < W:
                    M[ky, we * Cin:(we + 1) * Cin, w2 * Cout:(w2 + 1) * Cout] += blk
                if 0 <= wo < W:
                    M[ky, wo * Cin:(wo + 1) * Cin,
                      N + w2 * Cout:N + (w2 + 1) * Cout] += blk
    Mfull = M.reshape(3 * K, 2 * N)
    bt = np.tile(np.asarray(b, np.float32)[None, :], (1, Wp))    # (1, N)
    return Mfull, bt


def _build_fc_mat(fc_w, fc_b, C3, H3, W3):
    """Permute fc1 (code, C3*H3*W3) [torch NCHW flatten] to (H3*W3*C3, code)."""
    fw = np.asarray(fc_w, np.float32)
    code = fw.shape[0]
    wfc = (fw.reshape(code, C3, H3, W3)
             .transpose(2, 3, 1, 0)              # (H3, W3, C3, code)
             .reshape(H3 * W3 * C3, code))
    bfc = np.asarray(fc_b, np.float32).reshape(1, code)
    return wfc, bfc


def prepare_params(params, input_hw):
    H, W = input_hw
    assert H % 8 == 0 and W % 8 == 0, "input spatial dims must be divisible by 8"
    m1, b1 = _build_stage_mat(params["conv1_w"], params["conv1_b"], W)
    m2, b2 = _build_stage_mat(params["conv2_w"], params["conv2_b"], W // 2)
    m3, b3 = _build_stage_mat(params["conv3_w"], params["conv3_b"], W // 4)
    C3 = np.asarray(params["conv3_w"]).shape[0]
    wfc, bfc = _build_fc_mat(params["fc1_w"], params["fc1_b"], C3, H // 8, W // 8)
    return tuple(jnp.asarray(a) for a in (m1, b1, m2, b2, m3, b3, wfc, bfc))


# ----------------------------------------------------------------------------
# Pure-JAX reference (matches the PyTorch module semantics exactly)
# ----------------------------------------------------------------------------
def reference_forward(x_nchw, params):
    x = x_nchw.astype(jnp.float32)
    for i in (1, 2, 3):
        w = params[f"conv{i}_w"]
        b = params[f"conv{i}_b"]
        x = lax.conv_general_dilated(
            x, w, window_strides=(1, 1), padding=((1, 1), (1, 1)),
            dimension_numbers=("NCHW", "OIHW", "NCHW"),
        )
        x = jnp.maximum(x + b[None, :, None, None], 0.0)
        x = lax.reduce_window(
            x, -jnp.inf, lax.max,
            window_dimensions=(1, 1, 2, 2), window_strides=(1, 1, 2, 2),
            padding="VALID",
        )
    B = x.shape[0]
    x = x.reshape(B, -1)  # NCHW flatten (torch nn.Flatten)
    return x @ params["fc1_w"].T + params["fc1_b"]


# ----------------------------------------------------------------------------
# Main
# ----------------------------------------------------------------------------
if __name__ == "__main__":
    # Module hyper-params (small, consistent with the forward pass):
    #   input_shape = (32, 32), conv_scale = 8, code_size = 16, dropout = 0.0
    batch = 2
    H_in = W_in = 32
    conv_scale = 8
    code_size = 16
    flat_size = (H_in // 8) * (W_in // 8) * (conv_scale * 4)  # 4*4*32 = 512

    key = jax.random.PRNGKey(0)
    ks = jax.random.split(key, 9)

    def _init(k, shape, fan_in):
        bound = 1.0 / np.sqrt(fan_in)
        return jax.random.uniform(k, shape, jnp.float32, -bound, bound)

    params = {
        "conv1_w": _init(ks[0], (conv_scale, 1, 3, 3), 1 * 9),
        "conv1_b": _init(ks[1], (conv_scale,), 1 * 9),
        "conv2_w": _init(ks[2], (conv_scale * 2, conv_scale, 3, 3), conv_scale * 9),
        "conv2_b": _init(ks[3], (conv_scale * 2,), conv_scale * 9),
        "conv3_w": _init(ks[4], (conv_scale * 4, conv_scale * 2, 3, 3),
                         conv_scale * 2 * 9),
        "conv3_b": _init(ks[5], (conv_scale * 4,), conv_scale * 2 * 9),
        "fc1_w": _init(ks[6], (code_size, flat_size), flat_size),
        "fc1_b": _init(ks[7], (code_size,), flat_size),
    }

    x = jax.random.normal(ks[8], (batch, 1, H_in, W_in), jnp.float32)

    # One-time host-side weight preparation (kept out of the per-call path).
    prep = prepare_params(params, (H_in, W_in))

    # Batch-folding policy: fold batch into M on single-TC chips, parallel grid on v7x.
    ipb = _images_per_block(batch)

    out = extensible_encoder_forward(x, prep, ipb)
    out = jax.block_until_ready(out)

    ref = reference_forward(x, params)
    assert out.shape == (batch, code_size), out.shape
    np.testing.assert_allclose(np.asarray(out), np.asarray(ref),
                               rtol=1e-3, atol=1e-3)

    print("KERNEL_OK")
</pallas_src>

<mosaic_0001>
module attributes {stable_mosaic.version = 11 : i64} {
  func.func @_encoder_kernel(%arg0: i32, %arg1: memref<32x32xf32, #tpu.memory_space<vmem>>, %arg2: memref<96x256xf32, #tpu.memory_space<vmem>>, %arg3: memref<1x128xf32, #tpu.memory_space<vmem>>, %arg4: memref<384x256xf32, #tpu.memory_space<vmem>>, %arg5: memref<1x128xf32, #tpu.memory_space<vmem>>, %arg6: memref<384x256xf32, #tpu.memory_space<vmem>>, %arg7: memref<1x128xf32, #tpu.memory_space<vmem>>, %arg8: memref<512x16xf32, #tpu.memory_space<vmem>>, %arg9: memref<1x16xf32, #tpu.memory_space<vmem>>, %arg10: memref<1x1x16xf32, #tpu.memory_space<vmem>>, %arg11: memref<32x128xf32, #tpu.memory_space<vmem>>, %arg12: memref<1x512xf32, #tpu.memory_space<vmem>>) attributes {dimension_semantics = [#tpu.dimension_semantics<parallel>], iteration_bounds = array<i64: 2>, scalar_prefetch = 0 : i64, scratch_operands = 2 : i64, tpu.core_type = #tpu.core_type<tc>, window_params = [{transform_indices = @transform_0, window_bounds = array<i64: 32, 32>}, {pipeline_mode = #tpu.pipeline_mode<synchronous>, transform_indices = @transform_1, window_bounds = array<i64: 96, 256>}, {pipeline_mode = #tpu.pipeline_mode<synchronous>, transform_indices = @transform_2, window_bounds = array<i64: 1, 128>}, {pipeline_mode = #tpu.pipeline_mode<synchronous>, transform_indices = @transform_3, window_bounds = array<i64: 384, 256>}, {pipeline_mode = #tpu.pipeline_mode<synchronous>, transform_indices = @transform_4, window_bounds = array<i64: 1, 128>}, {pipeline_mode = #tpu.pipeline_mode<synchronous>, transform_indices = @transform_5, window_bounds = array<i64: 384, 256>}, {pipeline_mode = #tpu.pipeline_mode<synchronous>, transform_indices = @transform_6, window_bounds = array<i64: 1, 128>}, {pipeline_mode = #tpu.pipeline_mode<synchronous>, transform_indices = @transform_7, window_bounds = array<i64: 512, 16>}, {pipeline_mode = #tpu.pipeline_mode<synchronous>, transform_indices = @transform_8, window_bounds = array<i64: 1, 16>}, {transform_indices = @transform_9, window_bounds = array<i64: 1, 1, 16>}]} {
    %c0 = arith.constant 0 : index
    %c0_0 = arith.constant 0 : index
    %0 = vector.load %arg1[%c0, %c0_0] : memref<32x32xf32, #tpu.memory_space<vmem>>, vector<32x32xf32>
    %1 = tpu.iota {dimensions = array<i32: 0>} : vector<32x32xi32>
    %c32_i32 = arith.constant 32 : i32
    %c0_i32 = arith.constant 0 : i32
    %2 = arith.cmpi eq, %c32_i32, %c0_i32 : i32
    %c1_i32 = arith.constant 1 : i32
    %3 = arith.select %2, %c1_i32, %c32_i32 : i32
    %4 = vector.broadcast %3 : i32 to vector<32x32xi32>
    %5 = arith.remsi %1, %4 : vector<32x32xi32>
    %c0_i32_1 = arith.constant 0 : i32
    %6 = vector.broadcast %c0_i32_1 : i32 to vector<32x32xi32>
    %7 = arith.cmpi ne, %5, %6 : vector<32x32xi32>
    %c0_i32_2 = arith.constant 0 : i32
    %8 = vector.broadcast %c0_i32_2 : i32 to vector<32x32xi32>
    %9 = arith.cmpi slt, %5, %8 : vector<32x32xi32>
    %c0_i32_3 = arith.constant 0 : i32
    %10 = arith.cmpi slt, %3, %c0_i32_3 : i32
    %11 = vector.broadcast %10 : i1 to vector<32x32xi1>
    %12 = vector.broadcast %11 : vector<32x32xi1> to vector<32x32xi1>
    %13 = arith.xori %9, %12 : vector<32x32xi1>
    %14 = arith.andi %13, %7 : vector<32x32xi1>
    %15 = vector.broadcast %3 : i32 to vector<32x32xi32>
    %16 = arith.addi %5, %15 : vector<32x32xi32>
    %17 = arith.select %14, %16, %5 : vector<32x32xi1>, vector<32x32xi32>
    %c0_i32_4 = arith.constant 0 : i32
    %18 = vector.broadcast %c0_i32_4 : i32 to vector<32x32xi32>
    %19 = arith.cmpi eq, %17, %18 : vector<32x32xi32>
    %c1_i32_5 = arith.constant 1 : i32
    %20 = tpu.dynamic_rotate %0 by %c1_i32_5 dim 0 : vector<32x32xf32>, i32 -> vector<32x32xf32>
    %cst = arith.constant 0.000000e+00 : f32
    %21 = vector.broadcast %cst : f32 to vector<32x32xf32>
    %22 = arith.select %19, %21, %20 : vector<32x32xi1>, vector<32x32xf32>
    %c31_i32 = arith.constant 31 : i32
    %23 = vector.broadcast %c31_i32 : i32 to vector<32x32xi32>
    %24 = arith.cmpi eq, %17, %23 : vector<32x32xi32>
    %c31_i32_6 = arith.constant 31 : i32
    %25 = tpu.dynamic_rotate %0 by %c31_i32_6 dim 0 : vector<32x32xf32>, i32 -> vector<32x32xf32>
    %cst_7 = arith.constant 0.000000e+00 : f32
    %26 = vector.broadcast %cst_7 : f32 to vector<32x32xf32>
    %27 = arith.select %24, %26, %25 : vector<32x32xi1>, vector<32x32xf32>
    %28 = tpu.concatenate %22, %0, %27 in 1 : vector<32x32xf32>, vector<32x32xf32>, vector<32x32xf32> -> vector<32x96xf32>
    %c0_8 = arith.constant 0 : index
    %c0_9 = arith.constant 0 : index
    %29 = vector.load %arg2[%c0_8, %c0_9] : memref<96x256xf32, #tpu.memory_space<vmem>>, vector<96x256xf32>
    %cst_10 = arith.constant dense<0.000000e+00> : vector<32x256xf32>
    %30 = tpu.matmul %28, %29, %cst_10 {dimension_numbers = #tpu.dot_dimension_numbers<[1], [0], [0], [1], [0, 0, 1, 1], [], []>} : vector<32x96xf32>, vector<96x256xf32>, vector<32x256xf32> -> vector<32x256xf32>
    %31 = vector.extract_strided_slice %30 {offsets = [0, 0], sizes = [32, 128], strides = [1, 1]} : vector<32x256xf32> to vector<32x128xf32>
    %32 = vector.extract_strided_slice %30 {offsets = [0, 128], sizes = [32, 128], strides = [1, 1]} : vector<32x256xf32> to vector<32x128xf32>
    %33 = arith.maximumf %31, %32 : vector<32x128xf32>
    %c31_i32_11 = arith.constant 31 : i32
    %34 = tpu.dynamic_rotate %33 by %c31_i32_11 dim 0 : vector<32x128xf32>, i32 -> vector<32x128xf32>
    %35 = arith.maximumf %33, %34 : vector<32x128xf32>
    %c0_12 = arith.constant 0 : index
    %c0_13 = arith.constant 0 : index
    %36 = vector.load %arg11[%c0_12, %c0_13] : memref<32x128xf32, #tpu.memory_space<vmem>>, vector<32x128xf32>
    tpu.vector_store %arg11[%c0_12, %c0_13], %35 {strides = array<i32>} : memref<32x128xf32, #tpu.memory_space<vmem>>, vector<32x128xf32>,
    %c0_14 = arith.constant 0 : index
    %c0_15 = arith.constant 0 : index
    %37 = tpu.strided_load %arg11[%c0_14, %c0_15] {strides = array<i32: 2, 1>} : memref<32x128xf32, #tpu.memory_space<vmem>>, vector<16x128xf32>
    %c0_16 = arith.constant 0 : index
    %c0_17 = arith.constant 0 : index
    %38 = vector.load %arg3[%c0_16, %c0_17] : memref<1x128xf32, #tpu.memory_space<vmem>>, vector<1x128xf32>
    %39 = vector.broadcast %38 : vector<1x128xf32> to vector<16x128xf32>
    %40 = arith.addf %37, %39 : vector<16x128xf32>
    %cst_18 = arith.constant 0.000000e+00 : f32
    %41 = vector.broadcast %cst_18 : f32 to vector<16x128xf32>
    %42 = arith.maximumf %40, %41 : vector<16x128xf32>
    %43 = tpu.iota {dimensions = array<i32: 0>} : vector<16x128xi32>
    %c16_i32 = arith.constant 16 : i32
    %c0_i32_19 = arith.constant 0 : i32
    %44 = arith.cmpi eq, %c16_i32, %c0_i32_19 : i32
    %c1_i32_20 = arith.constant 1 : i32
    %45 = arith.select %44, %c1_i32_20, %c16_i32 : i32
    %46 = vector.broadcast %45 : i32 to vector<16x128xi32>
    %47 = arith.remsi %43, %46 : vector<16x128xi32>
    %c0_i32_21 = arith.constant 0 : i32
    %48 = vector.broadcast %c0_i32_21 : i32 to vector<16x128xi32>
    %49 = arith.cmpi ne, %47, %48 : vector<16x128xi32>
    %c0_i32_22 = arith.constant 0 : i32
    %50 = vector.broadcast %c0_i32_22 : i32 to vector<16x128xi32>
    %51 = arith.cmpi slt, %47, %50 : vector<16x128xi32>
    %c0_i32_23 = arith.constant 0 : i32
    %52 = arith.cmpi slt, %45, %c0_i32_23 : i32
    %53 = vector.broadcast %52 : i1 to vector<16x128xi1>
    %54 = vector.broadcast %53 : vector<16x128xi1> to vector<16x128xi1>
    %55 = arith.xori %51, %54 : vector<16x128xi1>
    %56 = arith.andi %55, %49 : vector<16x128xi1>
    %57 = vector.broadcast %45 : i32 to vector<16x128xi32>
    %58 = arith.addi %47, %57 : vector<16x128xi32>
    %59 = arith.select %56, %58, %47 : vector<16x128xi1>, vector<16x128xi32>
    %c0_i32_24 = arith.constant 0 : i32
    %60 = vector.broadcast %c0_i32_24 : i32 to vector<16x128xi32>
    %61 = arith.cmpi eq, %59, %60 : vector<16x128xi32>
    %c1_i32_25 = arith.constant 1 : i32
    %62 = tpu.dynamic_rotate %42 by %c1_i32_25 dim 0 : vector<16x128xf32>, i32 -> vector<16x128xf32>
    %cst_26 = arith.constant 0.000000e+00 : f32
    %63 = vector.broadcast %cst_26 : f32 to vector<16x128xf32>
    %64 = arith.select %61, %63, %62 : vector<16x128xi1>, vector<16x128xf32>
    %c15_i32 = arith.constant 15 : i32
    %65 = vector.broadcast %c15_i32 : i32 to vector<16x128xi32>
    %66 = arith.cmpi eq, %59, %65 : vector<16x128xi32>
    %c15_i32_27 = arith.constant 15 : i32
    %67 = tpu.dynamic_rotate %42 by %c15_i32_27 dim 0 : vector<16x128xf32>, i32 -> vector<16x128xf32>
    %cst_28 = arith.constant 0.000000e+00 : f32
    %68 = vector.broadcast %cst_28 : f32 to vector<16x128xf32>
    %69 = arith.select %66, %68, %67 : vector<16x128xi1>, vector<16x128xf32>
    %70 = tpu.concatenate %64, %42, %69 in 1 : vector<16x128xf32>, vector<16x128xf32>, vector<16x128xf32> -> vector<16x384xf32>
    %c0_29 = arith.constant 0 : index
    %c0_30 = arith.constant 0 : index
    %71 = vector.load %arg4[%c0_29, %c0_30] : memref<384x256xf32, #tpu.memory_space<vmem>>, vector<384x256xf32>
    %cst_31 = arith.constant dense<0.000000e+00> : vector<16x256xf32>
    %72 = tpu.matmul %70, %71, %cst_31 {dimension_numbers = #tpu.dot_dimension_numbers<[1], [0], [0], [1], [0, 0, 1, 1], [], []>} : vector<16x384xf32>, vector<384x256xf32>, vector<16x256xf32> -> vector<16x256xf32>
    %73 = vector.extract_strided_slice %72 {offsets = [0, 0], sizes = [16, 128], strides = [1, 1]} : vector<16x256xf32> to vector<16x128xf32>
    %74 = vector.extract_strided_slice %72 {offsets = [0, 128], sizes = [16, 128], strides = [1, 1]} : vector<16x256xf32> to vector<16x128xf32>
    %75 = arith.maximumf %73, %74 : vector<16x128xf32>
    %c15_i32_32 = arith.constant 15 : i32
    %76 = tpu.dynamic_rotate %75 by %c15_i32_32 dim 0 : vector<16x128xf32>, i32 -> vector<16x128xf32>
    %77 = arith.maximumf %75, %76 : vector<16x128xf32>
    %c0_33 = arith.constant 0 : index
    %c0_34 = arith.constant 0 : index
    %78 = vector.load %arg11[%c0_33, %c0_34] : memref<32x128xf32, #tpu.memory_space<vmem>>, vector<16x128xf32>
    tpu.vector_store %arg11[%c0_33, %c0_34], %77 {strides = array<i32>} : memref<32x128xf32, #tpu.memory_space<vmem>>, vector<16x128xf32>,
    %c0_35 = arith.constant 0 : index
    %c0_36 = arith.constant 0 : index
    %79 = tpu.strided_load %arg11[%c0_35, %c0_36] {strides = array<i32: 2, 1>} : memref<32x128xf32, #tpu.memory_space<vmem>>, vector<8x128xf32>
    %c0_37 = arith.constant 0 : index
    %c0_38 = arith.constant 0 : index
    %80 = vector.load %arg5[%c0_37, %c0_38] : memref<1x128xf32, #tpu.memory_space<vmem>>, vector<1x128xf32>
    %81 = vector.broadcast %80 : vector<1x128xf32> to vector<8x128xf32>
    %82 = arith.addf %79, %81 : vector<8x128xf32>
    %cst_39 = arith.constant 0.000000e+00 : f32
    %83 = vector.broadcast %cst_39 : f32 to vector<8x128xf32>
    %84 = arith.maximumf %82, %83 : vector<8x128xf32>
    %85 = tpu.iota {dimensions = array<i32: 0>} : vector<8x128xi32>
    %c8_i32 = arith.constant 8 : i32
    %c0_i32_40 = arith.constant 0 : i32
    %86 = arith.cmpi eq, %c8_i32, %c0_i32_40 : i32
    %c1_i32_41 = arith.constant 1 : i32
    %87 = arith.select %86, %c1_i32_41, %c8_i32 : i32
    %88 = vector.broadcast %87 : i32 to vector<8x128xi32>
    %89 = arith.remsi %85, %88 : vector<8x128xi32>
    %c0_i32_42 = arith.constant 0 : i32
    %90 = vector.broadcast %c0_i32_42 : i32 to vector<8x128xi32>
    %91 = arith.cmpi ne, %89, %90 : vector<8x128xi32>
    %c0_i32_43 = arith.constant 0 : i32
    %92 = vector.broadcast %c0_i32_43 : i32 to vector<8x128xi32>
    %93 = arith.cmpi slt, %89, %92 : vector<8x128xi32>
    %c0_i32_44 = arith.constant 0 : i32
    %94 = arith.cmpi slt, %87, %c0_i32_44 : i32
    %95 = vector.broadcast %94 : i1 to vector<8x128xi1>
    %96 = vector.broadcast %95 : vector<8x128xi1> to vector<8x128xi1>
    %97 = arith.xori %93, %96 : vector<8x128xi1>
    %98 = arith.andi %97, %91 : vector<8x128xi1>
    %99 = vector.broadcast %87 : i32 to vector<8x128xi32>
    %100 = arith.addi %89, %99 : vector<8x128xi32>
    %101 = arith.select %98, %100, %89 : vector<8x128xi1>, vector<8x128xi32>
    %c0_i32_45 = arith.constant 0 : i32
    %102 = vector.broadcast %c0_i32_45 : i32 to vector<8x128xi32>
    %103 = arith.cmpi eq, %101, %102 : vector<8x128xi32>
    %c1_i32_46 = arith.constant 1 : i32
    %104 = tpu.dynamic_rotate %84 by %c1_i32_46 dim 0 : vector<8x128xf32>, i32 -> vector<8x128xf32>
    %cst_47 = arith.constant 0.000000e+00 : f32
    %105 = vector.broadcast %cst_47 : f32 to vector<8x128xf32>
    %106 = arith.select %103, %105, %104 : vector<8x128xi1>, vector<8x128xf32>
    %c7_i32 = arith.constant 7 : i32
    %107 = vector.broadcast %c7_i32 : i32 to vector<8x128xi32>
    %108 = arith.cmpi eq, %101, %107 : vector<8x128xi32>
    %c7_i32_48 = arith.constant 7 : i32
    %109 = tpu.dynamic_rotate %84 by %c7_i32_48 dim 0 : vector<8x128xf32>, i32 -> vector<8x128xf32>
    %cst_49 = arith.constant 0.000000e+00 : f32
    %110 = vector.broadcast %cst_49 : f32 to vector<8x128xf32>
    %111 = arith.select %108, %110, %109 : vector<8x128xi1>, vector<8x128xf32>
    %112 = tpu.concatenate %106, %84, %111 in 1 : vector<8x128xf32>, vector<8x128xf32>, vector<8x128xf32> -> vector<8x384xf32>
    %c0_50 = arith.constant 0 : index
    %c0_51 = arith.constant 0 : index
    %113 = vector.load %arg6[%c0_50, %c0_51] : memref<384x256xf32, #tpu.memory_space<vmem>>, vector<384x256xf32>
    %cst_52 = arith.constant dense<0.000000e+00> : vector<8x256xf32>
    %114 = tpu.matmul %112, %113, %cst_52 {dimension_numbers = #tpu.dot_dimension_numbers<[1], [0], [0], [1], [0, 0, 1, 1], [], []>} : vector<8x384xf32>, vector<384x256xf32>, vector<8x256xf32> -> vector<8x256xf32>
    %115 = vector.extract_strided_slice %114 {offsets = [0, 0], sizes = [8, 128], strides = [1, 1]} : vector<8x256xf32> to vector<8x128xf32>
    %116 = vector.extract_strided_slice %114 {offsets = [0, 128], sizes = [8, 128], strides = [1, 1]} : vector<8x256xf32> to vector<8x128xf32>
    %117 = arith.maximumf %115, %116 : vector<8x128xf32>
    %c7_i32_53 = arith.constant 7 : i32
    %118 = tpu.dynamic_rotate %117 by %c7_i32_53 dim 0 : vector<8x128xf32>, i32 -> vector<8x128xf32>
    %119 = arith.maximumf %117, %118 : vector<8x128xf32>
    %c0_54 = arith.constant 0 : index
    %c0_55 = arith.constant 0 : index
    %120 = vector.load %arg11[%c0_54, %c0_55] : memref<32x128xf32, #tpu.memory_space<vmem>>, vector<8x128xf32>
    tpu.vector_store %arg11[%c0_54, %c0_55], %119 {strides = array<i32>} : memref<32x128xf32, #tpu.memory_space<vmem>>, vector<8x128xf32>,
    %c0_56 = arith.constant 0 : index
    %c0_57 = arith.constant 0 : index
    %121 = tpu.strided_load %arg11[%c0_56, %c0_57] {strides = array<i32: 2, 1>} : memref<32x128xf32, #tpu.memory_space<vmem>>, vector<4x128xf32>
    %c0_58 = arith.constant 0 : index
    %c0_59 = arith.constant 0 : index
    %122 = vector.load %arg7[%c0_58, %c0_59] : memref<1x128xf32, #tpu.memory_space<vmem>>, vector<1x128xf32>
    %123 = vector.broadcast %122 : vector<1x128xf32> to vector<4x128xf32>
    %124 = arith.addf %121, %123 : vector<4x128xf32>
    %cst_60 = arith.constant 0.000000e+00 : f32
    %125 = vector.broadcast %cst_60 : f32 to vector<4x128xf32>
    %126 = arith.maximumf %124, %125 : vector<4x128xf32>
    %127 = vector.extract_strided_slice %126 {offsets = [0, 0], sizes = [1, 128], strides = [1, 1]} : vector<4x128xf32> to vector<1x128xf32>
    %c0_61 = arith.constant 0 : index
    %c0_62 = arith.constant 0 : index
    %128 = vector.load %arg12[%c0_61, %c0_62] : memref<1x512xf32, #tpu.memory_space<vmem>>, vector<1x128xf32>
    tpu.vector_store %arg12[%c0_61, %c0_62], %127 {strides = array<i32>} : memref<1x512xf32, #tpu.memory_space<vmem>>, vector<1x128xf32>,
    %129 = vector.extract_strided_slice %126 {offsets = [1, 0], sizes = [1, 128], strides = [1, 1]} : vector<4x128xf32> to vector<1x128xf32>
    %c0_63 = arith.constant 0 : index
    %c128 = arith.constant 128 : index
    %130 = vector.load %arg12[%c0_63, %c128] : memref<1x512xf32, #tpu.memory_space<vmem>>, vector<1x128xf32>
    tpu.vector_store %arg12[%c0_63, %c128], %129 {strides = array<i32>} : memref<1x512xf32, #tpu.memory_space<vmem>>, vector<1x128xf32>,
    %131 = vector.extract_strided_slice %126 {offsets = [2, 0], sizes = [1, 128], strides = [1, 1]} : vector<4x128xf32> to vector<1x128xf32>
    %c0_64 = arith.constant 0 : index
    %c256 = arith.constant 256 : index
    %132 = vector.load %arg12[%c0_64, %c256] : memref<1x512xf32, #tpu.memory_space<vmem>>, vector<1x128xf32>
    tpu.vector_store %arg12[%c0_64, %c256], %131 {strides = array<i32>} : memref<1x512xf32, #tpu.memory_space<vmem>>, vector<1x128xf32>,
    %133 = vector.extract_strided_slice %126 {offsets = [3, 0], sizes = [1, 128], strides = [1, 1]} : vector<4x128xf32> to vector<1x128xf32>
    %c0_65 = arith.constant 0 : index
    %c384 = arith.constant 384 : index
    %134 = vector.load %arg12[%c0_65, %c384] : memref<1x512xf32, #tpu.memory_space<vmem>>, vector<1x128xf32>
    tpu.vector_store %arg12[%c0_65, %c384], %133 {strides = array<i32>} : memref<1x512xf32, #tpu.memory_space<vmem>>, vector<1x128xf32>,
    %c0_66 = arith.constant 0 : index
    %c0_67 = arith.constant 0 : index
    %135 = vector.load %arg12[%c0_66, %c0_67] : memref<1x512xf32, #tpu.memory_space<vmem>>, vector<1x512xf32>
    %c0_68 = arith.constant 0 : index
    %c0_69 = arith.constant 0 : index
    %136 = vector.load %arg8[%c0_68, %c0_69] : memref<512x16xf32, #tpu.memory_space<vmem>>, vector<512x16xf32>
    %cst_70 = arith.constant dense<0.000000e+00> : vector<1x16xf32>
    %137 = tpu.matmul %135, %136, %cst_70 {dimension_numbers = #tpu.dot_dimension_numbers<[1], [0], [0], [1], [0, 0, 1, 1], [], []>} : vector<1x512xf32>, vector<512x16xf32>, vector<1x16xf32> -> vector<1x16xf32>
    %c0_71 = arith.constant 0 : index
    %c0_72 = arith.constant 0 : index
    %138 = vector.load %arg9[%c0_71, %c0_72] : memref<1x16xf32, #tpu.memory_space<vmem>>, vector<1x16xf32>
    %139 = arith.addf %137, %138 : vector<1x16xf32>
    %c0_73 = arith.constant 0 : index
    %c0_74 = arith.constant 0 : index
    %c0_75 = arith.constant 0 : index
    %140 = vector.load %arg10[%c0_73, %c0_74, %c0_75] : memref<1x1x16xf32, #tpu.memory_space<vmem>>, vector<1x1x16xf32>
    %141 = vector.shape_cast %140 : vector<1x1x16xf32> to vector<1x16xf32>
    %142 = vector.shape_cast %139 : vector<1x16xf32> to vector<1x1x16xf32>
    tpu.vector_store %arg10[%c0_73, %c0_74, %c0_75], %142 {strides = array<i32>} : memref<1x1x16xf32, #tpu.memory_space<vmem>>, vector<1x1x16xf32>,
    return
  }
  func.func @transform_0(%arg0: i32) -> (i32, i32) {
    %c0_i32 = arith.constant 0 : i32
    %c0_i32_0 = arith.constant 0 : i32
    return %arg0, %c0_i32 : i32, i32
  }
  func.func @transform_1(%arg0: i32) -> (i32, i32) {
    %c0_i32 = arith.constant 0 : i32
    %c0_i32_0 = arith.constant 0 : i32
    %c0_i32_1 = arith.constant 0 : i32
    return %c0_i32, %c0_i32_0 : i32, i32
  }
  func.func @transform_2(%arg0: i32) -> (i32, i32) {
    %c0_i32 = arith.constant 0 : i32
    %c0_i32_0 = arith.constant 0 : i32
    %c0_i32_1 = arith.constant 0 : i32
    return %c0_i32, %c0_i32_0 : i32, i32
  }
  func.func @transform_3(%arg0: i32) -> (i32, i32) {
    %c0_i32 = arith.constant 0 : i32
    %c0_i32_0 = arith.constant 0 : i32
    %c0_i32_1 = arith.constant 0 : i32
    return %c0_i32, %c0_i32_0 : i32, i32
  }
  func.func @transform_4(%arg0: i32) -> (i32, i32) {
    %c0_i32 = arith.constant 0 : i32
    %c0_i32_0 = arith.constant 0 : i32
    %c0_i32_1 = arith.constant 0 : i32
    return %c0_i32, %c0_i32_0 : i32, i32
  }
  func.func @transform_5(%arg0: i32) -> (i32, i32) {
    %c0_i32 = arith.constant 0 : i32
    %c0_i32_0 = arith.constant 0 : i32
    %c0_i32_1 = arith.constant 0 : i32
    return %c0_i32, %c0_i32_0 : i32, i32
  }
  func.func @transform_6(%arg0: i32) -> (i32, i32) {
    %c0_i32 = arith.constant 0 : i32
    %c0_i32_0 = arith.constant 0 : i32
    %c0_i32_1 = arith.constant 0 : i32
    return %c0_i32, %c0_i32_0 : i32, i32
  }
  func.func @transform_7(%arg0: i32) -> (i32, i32) {
    %c0_i32 = arith.constant 0 : i32
    %c0_i32_0 = arith.constant 0 : i32
    %c0_i32_1 = arith.constant 0 : i32
    return %c0_i32, %c0_i32_0 : i32, i32
  }
  func.func @transform_8(%arg0: i32) -> (i32, i32) {
    %c0_i32 = arith.constant 0 : i32
    %c0_i32_0 = arith.constant 0 : i32
    %c0_i32_1 = arith.constant 0 : i32
    return %c0_i32, %c0_i32_0 : i32, i32
  }
  func.func @transform_9(%arg0: i32) -> (i32, i32, i32) {
    %c0_i32 = arith.constant 0 : i32
    %c0_i32_0 = arith.constant 0 : i32
    %c0_i32_1 = arith.constant 0 : i32
    return %arg0, %c0_i32, %c0_i32_0 : i32, i32, i32
  }
}

</mosaic_0001>

<bundles_post_ra>
// kernel: extensible_encoder_forward.1
= control target key start
LH: loop header
LB: loop body
LE: loop exit
PB: predicated region body
PF: predicated region fallthrough
CT: control target
= control target key end

     0   :  { %14 = vsyncpa [#allocation5], 0  ;;  %s2799_s0 = inlined_call_operand.vmem [shape: f32[64,32], index: 0, kind: input, shape index: {}]   ;;  %s2800_s1 = inlined_call_operand.vmem [shape: f32[96,256], index: 1, kind: input, shape index: {}]   ;;  %s2801_s2 = inlined_call_operand.vmem [shape: f32[1,128], index: 2, kind: input, shape index: {}]   ;;  %s2802_s3 = inlined_call_operand.hbm [shape: f32[384,256], index: 3, kind: input, shape index: {}]   ;;  %s2803_s4 = inlined_call_operand.vmem [shape: f32[1,128], index: 4, kind: input, shape index: {}]   ;;  %s2804_s5 = inlined_call_operand.hbm [shape: f32[384,256], index: 5, kind: input, shape index: {}]   ;;  %s2805_s6 = inlined_call_operand.vmem [shape: f32[1,128], index: 6, kind: input, shape index: {}]   ;;  %s2806_s7 = inlined_call_operand.vmem [shape: f32[512,16], index: 7, kind: input, shape index: {}]   ;;  %s2807_s8 = inlined_call_operand.vmem [shape: f32[1,16], index: 8, kind: input, shape index: {}]   ;;  %s2808_s9 = inlined_call_operand.hbm [shape: f32[2,1,16], index: 9, kind: output, shape index: {}]  }
   0x1   :  { %15 = vsyncpa [#allocation8], 0 }
   0x2   :  { %16 = vsyncpa [#allocation6], 0 }
   0x3   :  { %18 = vsyncpa [#allocation6 + $0x1], 0  ;;  %s2231_s30 = smov 0   ;;  %s2233_s10 = smov 0  }
   0x4   :  { %s2235_s11 = smov 0   ;;  %s2237_s12 = smov 0  }
   0x5 LB: > { %2815 = sst [smem:[#allocation13_spill]] %s2166_s11  ;;  %s2252_s13 = sadd.s32 4294967295, %s2170_s12   ;;  %s2170_s12 = sphi %s2237_s12, %s2831_s12   ;;  %s2166_s11 = sphi %s2235_s11, %s2833_s11   ;;  %s2162_s10 = sphi %s2233_s10, %s2835_s10   ;;  %s2158_s30 = sphi %s2231_s30, %s2834_s30  }
   0x6   : > { %s1590_s14 = sadd.s32 4294967294, %s2170_s12   ;;  %s2256_s15 = sadd.s32 1, %s2170_s12  }
   0x7   : > { %2816 = sst [smem:[#allocation14_spill]] %s2256_s15  ;;  %s225_s16 = sadd.s32 1, %s2166_s11 }
   0x8   : > { %s222_s17 = ssub.s32 %s2170_s12, %s2256_s15  ;;  %p235_p0 = scmp.ne.s32.totalorder %s2166_s11, %s2162_s10 }
   0x9   : > { %p223_p1 = scmp.eq.s32.totalorder %s222_s17, 0  ;;  %p236_p2 = scmp.eq.s32.totalorder %s2252_s13, 1 }
   0xa   : > { %p241_p3 = scmp.ne.s32.totalorder %s2162_s10, %s2158_s30  ;;  %p242_p4 = scmp.eq.s32.totalorder %s1590_s14, 1 }
   0xb   : > { %s2267_s18 = scalar_select %p223_p1, %s2166_s11, %s225_s16  }
   0xc   : > { %p2269_p5 = por %p236_p2, %p235_p0  ;;  %p2273_p6 = por %p242_p4, %p241_p3 }
   0xd   : > { %2817 = sst [smem:[#allocation15_spill]] %s2267_s18  ;;  %p1591_p7 = scmp.ge.s32.totalorder %s2170_s12, 1 }
   0xe   : > { %s2818_s19 = scalar_select %p2269_p5, 1, 0 }
   0xf   : > { %s2819_s20 = scalar_select %p2273_p6, 1, 0 }
  0x10   : > { %p249_p8 = scmp.lt.s32.totalorder %s2170_s12, 3  ;;  %p2809_p9 = scmp.eq.s32.totalorder %s2252_s13, 0 }
  0x11   : > { %s2172_s22 = smov [#allocation4]   ;;  %s2173_s25 = smov [#allocation7]  }
  0x12   : > { %p2280_p10 = pnand %p1591_p7, %p249_p8  ;;  %s267_s23 = sshll.u32 %s2172_s22, 4  ;;  %s268_s23 = int_to_ptr.vmem [resolvable:$true] %s267_s23 }
  0x13   : > { %s283_s26 = sshll.u32 %s2173_s25, 4  ;;  %s2044_s29 = scalar_lea.hbm %s2802_s3, 12288  ;;  %s2292_s26 = int_to_ptr.vmem [resolvable:$true] %s283_s26 }
  0x14   : > { %s2820_s21 = scalar_select %p2280_p10, 1, 0 }
  0x15   : > { %p1988_p11 = pneg %p2280_p10  ;;  %p2045_p13 = scmp.ne.s32.totalorder %s2802_s3, %s2044_s29 }
  0x16   : > { %p2051_p3 = scmp.lt.u32.totalorder %s2044_s29, %s2802_s3 }
  0x17   : > { %p2288_p12 = pnand %p2809_p9, %p1988_p11 }
  0x19   : > { %p2046_p0 = pneg %p2288_p12 }
  0x1b   : > { %p2047_p1 = pnand %p2046_p0, %p2045_p13 }
  0x1d   : > { %p2048_p2 = pneg %p2047_p1 }
  0x1f   : > { %p2053_p4 = pnand %p2051_p3, %p2048_p2 }
  0x21   : > { %2056 = shalt.err (!%p2053_p4)
}
  0x22   : > { %s2057_s25 = scalar_lea.vmem %s268_s23, 12288  ;;  %p2065_p9 = scmp.lt.s32.totalorder %s268_s23, %s268_s23 }
  0x23   : > { %p2058_p7 = scmp.ne.s32.totalorder %s268_s23, %s2057_s25  ;;  %p2066_p6 = scmp.lt.s32.totalorder %s2057_s25, %s2057_s25 }
  0x25   : > { %p2060_p8 = pnand %p2058_p7, %p2046_p0  ;;  %p2067_p5 = por %p2066_p6, %p2065_p9 }
  0x27   : > { %p2061_p11 = pneg %p2060_p8 }
  0x29   : > { %p2068_p10 = pnand %p2067_p5, %p2061_p11 }
  0x2b   : > { %2071 = shalt.err (!%p2068_p10)
}
  0x2c   : > { %s2174_s27 = smov 256   ;;  %s2175_s28 = smov 16  }
  0x2d   : > { %1991 = dma.hbm_to_vmem [thread:$0]  (!%p2288_p12), %s2802_s3, 12288, %s268_s23, [#allocation5], %s2174_s27, %s2174_s27, %s2175_s28  }
  0x2e   : > { %s2072_s22 = scalar_lea.hbm %s2804_s5, 12288 }
  0x2f   : > { %p2073_p13 = scmp.ne.s32.totalorder %s2804_s5, %s2072_s22  ;;  %p2079_p9 = scmp.lt.u32.totalorder %s2072_s22, %s2804_s5 }
  0x31   : > { %p2075_p5 = pnand %p2073_p13, %p2046_p0 }
  0x33   : > { %p2076_p6 = pneg %p2075_p5 }
  0x35   : > { %p2081_p10 = pnand %p2079_p9, %p2076_p6 }
  0x37   : > { %2084 = shalt.err (!%p2081_p10)
}
  0x38   : > { %s2085_s23 = scalar_lea.vmem %s2292_s26, 12288  ;;  %p2093_p4 = scmp.lt.s32.totalorder %s2292_s26, %s2292_s26 }
  0x39   : > { %p2086_p1 = scmp.ne.s32.totalorder %s2292_s26, %s2085_s23  ;;  %p2094_p7 = scmp.lt.s32.totalorder %s2085_s23, %s2085_s23 }
  0x3b   : > { %p2088_p2 = pnand %p2086_p1, %p2046_p0  ;;  %p2095_p8 = por %p2094_p7, %p2093_p4 }
  0x3d   : > { %p2089_p3 = pneg %p2088_p2 }
  0x3f   : > { %p2096_p11 = pnand %p2095_p8, %p2089_p3 }
  0x41   : > { %2099 = shalt.err (!%p2096_p11)
}
  0x42   : > { %1994 = dma.hbm_to_vmem [thread:$0]  (!%p2288_p12), %s2804_s5, 12288, %s2292_s26, [#allocation8], %s2174_s27, %s2174_s27, %s2175_s28  }
  0x43   : > { %p2822_p13 = scmp.ne.s32.totalorder %s2820_s21, 0 }
  0x44   : > { %p2823_p5 = scmp.eq.s32.totalorder (!%p2822_p13), %s2252_s13, 0 }
  0x45   : > { %317 = sbr.rel (%p2822_p13) target bundleno = 1240 (0x4d8), region = 56 }
  0x4c   : > { %2145 = dma.done.wait (%p2823_p5), [#allocation5], 12288   ;;  %p2824_p0 = pmov %p2823_p5 }
  0x4e   : > { %2147 = vsyncadd (%p2824_p0), [#allocation5], 4294955008  ;;  %p2825_p6 = pmov %p2824_p0 }
  0x4f   : > { %p2826_p9 = pmov %p2824_p0 }
  0x50   : > { %2149 = dma.done.wait (%p2825_p6), [#allocation8], 12288  }
  0x51   : > { %2151 = vsyncadd (%p2826_p9), [#allocation8], 4294955008  ;;  %s1598_s18 = sshll.u32 %s2252_s13, 2  ;;  %v366_v0 = vlaneseq  ;;  %v2176_v2 = vmov 0.0   ;;  %s2177_s28 = smov 32   ;;  %v496_v12 = vld [vmem:[%s2800_s1 + $0x8] sm:$0xff] }
  0x52   : > { %p357_p10 = scmp.lt.s32.totalorder %s1598_s18, 7  ;;  %596 = vmatprep.mubr.f32.mxu0 %v2176_v2  ;;  %v498_v16 = vld [vmem:[%s2800_s1 + $0x18] sm:$0xff]  ;;  %v495_v17 = vld [vmem:[%s2800_s1] sm:$0xff]  ;;  %v497_v18 = vld [vmem:[%s2800_s1 + $0x10] sm:$0xff]  ;;  %s2178_s16 = smov 64   ;;  %vm485_vm4 = vcmask 261120  }
  0x53   : > { %v2353_v1 = vshrl.u32 %v366_v0, 7  ;;  %v1692_v20 = vpack.c.bf16 %v498_v16, %v496_v12  ;;  %v1694_v21 = vpack.c.bf16 %v497_v18, %v495_v17  ;;  %v500_v22 = vld [vmem:[%s2800_s1 + $0x28] sm:$0xff]  ;;  %v502_v23 = vld [vmem:[%s2800_s1 + $0x38] sm:$0xff]  ;;  %v499_v27 = vld [vmem:[%s2800_s1 + $0x20] sm:$0xff]  ;;  %vm490_vm5 = vcmask 523264   ;;  %s354_s23 = sand.u32 1, %s2162_s10  }
  0x54   : > { %s2837_s18 = smov (!%p357_p10, %s1598_s18), 7  ;;  %v1696_v26 = vpack.c.bf16 %v502_v23, %v500_v22  ;;  %v501_v28 = vld [vmem:[%s2800_s1 + $0x30] sm:$0xff]  ;;  %v504_v29 = vld [vmem:[%s2800_s1 + $0x48] sm:$0xff]  ;;  %v506_v30 = vld [vmem:[%s2800_s1 + $0x58] sm:$0xff]  ;;  %vm519_vm6 = vcmask 785408   ;;  %vm1237_vm11 = vcmp.lt.s32.totalorder %v366_v0, 128 }
  0x55   : > { %v370_v3 = vadd.s32 24, %v2353_v1  ;;  %s1599_s21 = sshll.u32 %s2837_s18, 3  ;;  %vm444_vm0 = vcmp.lt.s32.totalorder %v2353_v1, 7  ;;  %vm427_vm1 = vcmp.lt.s32.totalorder %v2353_v1, 1  ;;  %1693 = vmatprep.subr.bf16.mxu0 %v1692_v20  ;;  %v1698_v37 = vpack.c.bf16 %v501_v28, %v499_v27  ;;  %v696_v38 = vld [vmem:[#allocation4 + $0x8] sm:$0xff]  ;;  %v503_v40 = vld [vmem:[%s2800_s1 + $0x40] sm:$0xff] }
  0x56   : > { %s360_s27 = scalar_lea.vmem %s2799_s0, %s1599_s21  ;;  %1695 = vmatpush1.bf16.msra.mxu0 %v1694_v21  ;;  %v1700_v39 = vpack.c.bf16 %v506_v30, %v504_v29  ;;  %v505_v41 = vld [vmem:[%s2800_s1 + $0x50] sm:$0xff]  ;;  %v508_v44 = vld [vmem:[%s2800_s1 + $0x68] sm:$0xff]  ;;  %v510_v45 = vld [vmem:[%s2800_s1 + $0x78] sm:$0xff]  ;;  %v1348_v0 = vsub.s32 2, %v2353_v1  ;;  %s1615_s18 = sshll.u32 %s2252_s13, 4  ;;  %vm1498_vm12 = vcmask 122880  }
  0x57   : > { %v362_v4 = vld [vmem:[%s360_s27] sm:$0xff]  ;;  %v363_v5 = vld [vmem:[%s360_s27 + $0x8] sm:$0xff]  ;;  %v364_v6 = vld [vmem:[%s360_s27 + $0x10] sm:$0xff]  ;;  %v396_v11 = vand.u32 31, %v370_v3  ;;  %1697 = vmatprep.subr.bf16.mxu0 %v1696_v26  ;;  %v1702_v53 = vpack.c.bf16 %v505_v41, %v503_v40  ;;  %v1704_v58 = vpack.c.bf16 %v510_v45, %v508_v44  ;;  %s355_s21 = scalar_lea.vmem [#allocation9], %s354_s23  ;;  %s2757_s26 = scalar_lea.hbm %s2808_s9, %s1615_s18 }
  0x58   : > { %457 = vrot.lane.b32.xlu0 %v362_v4, %s2177_s28  ;;  %v423_v7 = vrot.slane %v362_v4, 7  ;;  %v440_v8 = vrot.slane %v362_v4, 1  ;;  %459 = vrot.lane.b32.xlu1 %v363_v5, %s2177_s28  ;;  %v441_v9 = vrot.slane %v363_v5, 1  ;;  %v2364_v10 = vld [vmem:[%s360_s27 + $0x18] sm:$0xff]  ;;  %v424_v13 = vrot.slane %v363_v5, 7  ;;  %v507_v48 = vld [vmem:[%s2800_s1 + $0x60] sm:$0xff] }
  0x59   : > { %v442_v14 = vrot.slane %v364_v6, 1  ;;  %v443_v15 = vrot.slane %v2364_v10, 1  ;;  %v426_v24 = vrot.slane %v2364_v10, 7  ;;  %v425_v34 = vrot.slane %v364_v6, 7  ;;  %v698_v46 = vld [vmem:[#allocation4 + $0x18] sm:$0xff]  ;;  %v509_v49 = vld [vmem:[%s2800_s1 + $0x70] sm:$0xff] }
  0x5a   : > { %v447_v19 = vsel %vm444_vm0, %v440_v8, %v441_v9  ;;  %v2412_v33 = vsel %vm427_vm1, %v423_v7, %v424_v13  ;;  %vm2414_vm2 = vcmp.eq.s32.totalorder %v396_v11, 31  ;;  %v1716_v50 = vpack.c.bf16 %v698_v46, %v696_v38  ;;  %v695_v51 = vld [vmem:[#allocation4] sm:$0xff]  ;;  %v697_v52 = vld [vmem:[#allocation4 + $0x10] sm:$0xff]  ;;  %1699 = vmatpush1.bf16.msra.mxu0 %v1698_v37  ;;  %v700_v55 = vld [vmem:[#allocation4 + $0x28] sm:$0xff]  ;;  %s1513_s24 = sshll.u32 %s355_s21, 4  ;;  %s1501_s27 = scalar_lea.sflag [#allocation6], %s354_s23  ;;  %s2759_s24 = int_to_ptr.vmem [resolvable:$true] %s1513_s24 }
  0x5b   : > { %v446_v25 = vsel %vm444_vm0, %v441_v9, %v442_v14  ;;  %v2406_v31 = vsel %vm427_vm1, %v426_v24, %v423_v7  ;;  %v445_v32 = vsel %vm444_vm0, %v442_v14, %v443_v15  ;;  %v448_v36 = vsel %vm444_vm0, %v443_v15, %v440_v8  ;;  %v702_v56 = vld [vmem:[#allocation4 + $0x38] sm:$0xff]  ;;  %v699_v57 = vld [vmem:[#allocation4 + $0x20] sm:$0xff]  ;;  %1701 = vmatprep.subr.bf16.mxu0 %v1700_v39  ;;  %v701_v60 = vld [vmem:[#allocation4 + $0x30] sm:$0xff]  ;;  %s2100_s29 = scalar_lea.vmem %s2759_s24, 16  ;;  %p2829_p1 = scmp.ne.s32.totalorder %s2818_s19, 0 }
  0x5c   : > { %473 = vrot.lane.b32.xlu0 %v447_v19, %s2178_s16  ;;  %475 = vrot.lane.b32.xlu1 %v446_v25, %s2178_s16  ;;  %v2428_v42 = vsel %vm427_vm1, %v424_v13, %v425_v34  ;;  %v2432_v43 = vsel %vm427_vm1, %v425_v34, %v426_v24  ;;  %v452_v47 = vsel %vm2414_vm2, 0.0, %v448_v36  ;;  %v1718_v54 = vpack.c.bf16 %v697_v52, %v695_v51  ;;  %v704_v61 = vld [vmem:[#allocation4 + $0x48] sm:$0xff]  ;;  %v706_v62 = vld [vmem:[#allocation4 + $0x58] sm:$0xff]  ;;  %v703_v8 = vld [vmem:[#allocation4 + $0x40] sm:$0xff]  ;;  %p2101_p12 = scmp.ne.s32.totalorder %s2759_s24, %s2100_s29  ;;  %s2180_s13 = smov [#allocation9]  }
  0x5d   : > { %1717 = vmatprep.subr.bf16.mxu1 %v1716_v50  ;;  %v1720_v59 = vpack.c.bf16 %v702_v56, %v700_v55  ;;  %v512_v63 = vld [vmem:[%s2800_s1 + $0x88] sm:$0xff]  ;;  %v514_v3 = vld [vmem:[%s2800_s1 + $0x98] sm:$0xff]  ;;  %v1722_v4 = vpack.c.bf16 %v701_v60, %v699_v57  ;;  %v1706_v5 = vpack.c.bf16 %v509_v49, %v507_v48  ;;  %v1724_v7 = vpack.c.bf16 %v706_v62, %v704_v61  ;;  %v513_v11 = vld [vmem:[%s2800_s1 + $0x90] sm:$0xff]  ;;  %s2104_s14 = sshll.u32 %s2180_s13, 4  ;;  %s2105_s14 = int_to_ptr.vmem [resolvable:$false] %s2104_s14 }
  0x5e   : > { %1719 = vmatpush1.bf16.msra.mxu1 %v1718_v54  ;;  %1703 = vmatpush1.bf16.msra.mxu0 %v1702_v53  ;;  %v705_v9 = vld [vmem:[#allocation4 + $0x50] sm:$0xff]  ;;  %v708_v12 = vld [vmem:[#allocation4 + $0x68] sm:$0xff]  ;;  %v710_v13 = vld [vmem:[#allocation4 + $0x78] sm:$0xff]  ;;  %v375_v51 = vand.u32 31, %v2353_v1  ;;  %p2102_p2 = pnand %p2101_p12, %p2829_p1  ;;  %s2106_s17 = scalar_lea.vmem %s2105_s14, 32 }
  0x5f   : > { %1721 = vmatprep.subr.bf16.mxu1 %v1720_v59  ;;  %1705 = vmatprep.subr.bf16.mxu0 %v1704_v58  ;;  %v516_v14 = vld [vmem:[%s2800_s1 + $0xa8] sm:$0xff]  ;;  %v518_v15 = vld [vmem:[%s2800_s1 + $0xb8] sm:$0xff]  ;;  %v1726_v16 = vpack.c.bf16 %v705_v9, %v703_v8  ;;  %v515_v18 = vld [vmem:[%s2800_s1 + $0xa0] sm:$0xff]  ;;  %v1728_v19 = vpack.c.bf16 %v710_v13, %v708_v12  ;;  %p2107_p4 = scmp.lt.s32.totalorder %s2759_s24, %s2105_s14  ;;  %p2108_p7 = scmp.lt.s32.totalorder %s2106_s17, %s2100_s29 }
  0x60   : > { %461 = vrot.lane.b32.xlu0 %v364_v6, %s2177_s28  ;;  %477 = vrot.lane.b32.xlu1 %v445_v32, %s2178_s16  ;;  %v511_v6 = vld [vmem:[%s2800_s1 + $0x80] sm:$0xff]  ;;  %v709_v21 = vld [vmem:[#allocation4 + $0x70] sm:$0xff]  ;;  %v1712_v22 = vpack.c.bf16 %v518_v15, %v516_v14  ;;  %v712_v24 = vld [vmem:[#allocation4 + $0x88] sm:$0xff]  ;;  %vm419_vm3 = vcmp.eq.s32.totalorder %v375_v51, 0  ;;  %p2103_p3 = pneg %p2102_p2 }
  0x61   : > { %v1710_v17 = vpack.c.bf16 %v513_v11, %v511_v6  ;;  %v707_v20 = vld [vmem:[#allocation4 + $0x60] sm:$0xff]  ;;  %v517_v23 = vld [vmem:[%s2800_s1 + $0xb0] sm:$0xff]  ;;  %v714_v25 = vld [vmem:[#allocation4 + $0x98] sm:$0xff]  ;;  %v432_v54 = vsel %vm419_vm3, 0.0, %v2406_v31  ;;  %p2109_p8 = por %p2108_p7, %p2107_p4 }
  0x62   : > { %1723 = vmatpush1.bf16.msra.mxu1 %v1722_v4  ;;  %1707 = vmatpush1.bf16.msra.mxu0 %v1706_v5  ;;  %v1730_v26 = vpack.c.bf16 %v709_v21, %v707_v20  ;;  %v1714_v27 = vpack.c.bf16 %v517_v23, %v515_v18  ;;  %v1732_v28 = vpack.c.bf16 %v714_v25, %v712_v24  ;;  %v711_v29 = vld [vmem:[#allocation4 + $0x80] sm:$0xff]  ;;  %v713_v30 = vld [vmem:[#allocation4 + $0x90] sm:$0xff]  ;;  %v716_v32 = vld [vmem:[#allocation4 + $0xa8] sm:$0xff] }
  0x63   : > { %1725 = vmatprep.subr.bf16.mxu1 %v1724_v7  ;;  %v718_v34 = vld [vmem:[#allocation4 + $0xb8] sm:$0xff]  ;;  %v1734_v35 = vpack.c.bf16 %v713_v30, %v711_v29  ;;  %v715_v37 = vld [vmem:[#allocation4 + $0xa0] sm:$0xff]  ;;  %v717_v38 = vld [vmem:[#allocation4 + $0xb0] sm:$0xff]  ;;  %p2110_p11 = pnand %p2109_p8, %p2103_p3 }
  0x64   : > { %463 = vrot.lane.b32.xlu0 %v2364_v10, %s2177_s28  ;;  %479 = vrot.lane.b32.xlu1 %v452_v47, %s2178_s16  ;;  %v1708_v10 = vpack.c.bf16 %v514_v3, %v512_v63  ;;  %v1736_v36 = vpack.c.bf16 %v718_v34, %v716_v32  ;;  %v720_v39 = vld [vmem:[#allocation4 + $0xc8] sm:$0xff]  ;;  %v722_v40 = vld [vmem:[#allocation4 + $0xd8] sm:$0xff]  ;;  %v1738_v41 = vpack.c.bf16 %v717_v38, %v715_v37  ;;  %v719_v45 = vld [vmem:[#allocation4 + $0xc0] sm:$0xff] }
  0x65   : > { %v1740_v44 = vpack.c.bf16 %v722_v40, %v720_v39  ;;  %v721_v46 = vld [vmem:[#allocation4 + $0xd0] sm:$0xff]  ;;  %v724_v47 = vld [vmem:[#allocation4 + $0xe8] sm:$0xff]  ;;  %v726_v48 = vld [vmem:[#allocation4 + $0xf8] sm:$0xff] }
  0x66   : > { %1709 = vmatprep.subr.bf16.mxu0 %v1708_v10  ;;  %1727 = vmatpush1.bf16.msra.mxu1 %v1726_v16  ;;  %v1742_v49 = vpack.c.bf16 %v721_v46, %v719_v45  ;;  %v1744_v50 = vpack.c.bf16 %v726_v48, %v724_v47  ;;  %v725_v6 = vld [vmem:[#allocation4 + $0xf0] sm:$0xff]  ;;  %v728_v8 = vld [vmem:[#allocation4 + $0x108] sm:$0xff]  ;;  %v730_v9 = vld [vmem:[#allocation4 + $0x118] sm:$0xff] }
  0x67   : > { %1711 = vmatpush1.bf16.msra.mxu0 %v1710_v17  ;;  %1729 = vmatprep.subr.bf16.mxu1 %v1728_v19  ;;  %v1748_v10 = vpack.c.bf16 %v730_v9, %v728_v8  ;;  %v727_v11 = vld [vmem:[#allocation4 + $0x100] sm:$0xff]  ;;  %v729_v12 = vld [vmem:[#allocation4 + $0x110] sm:$0xff]  ;;  %v734_v14 = vld [vmem:[#allocation4 + $0x138] sm:$0xff] }
  0x68   : > { %1713 = vmatprep.subr.bf16.mxu0 %v1712_v22  ;;  %v1750_v13 = vpack.c.bf16 %v729_v12, %v727_v11  ;;  %v731_v16 = vld [vmem:[#allocation4 + $0x120] sm:$0xff]  ;;  %v733_v17 = vld [vmem:[#allocation4 + $0x130] sm:$0xff]  ;;  %v736_v19 = vld [vmem:[#allocation4 + $0x148] sm:$0xff] }
  0x69   : > { %v1754_v18 = vpack.c.bf16 %v733_v17, %v731_v16  ;;  %v738_v20 = vld [vmem:[#allocation4 + $0x158] sm:$0xff]  ;;  %v735_v22 = vld [vmem:[#allocation4 + $0x140] sm:$0xff]  ;;  %v737_v23 = vld [vmem:[#allocation4 + $0x150] sm:$0xff] }
  0x6a   : > { %1731 = vmatpush1.bf16.msra.mxu1 %v1730_v26  ;;  %v1756_v21 = vpack.c.bf16 %v738_v20, %v736_v19  ;;  %v1758_v24 = vpack.c.bf16 %v737_v23, %v735_v22  ;;  %v740_v25 = vld [vmem:[#allocation4 + $0x168] sm:$0xff]  ;;  %v742_v26 = vld [vmem:[#allocation4 + $0x178] sm:$0xff]  ;;  %v741_v29 = vld [vmem:[#allocation4 + $0x170] sm:$0xff] }
  0x6b   : > { %1715 = vmatpush1.bf16.msra.mxu0 %v1714_v27  ;;  %1733 = vmatprep.subr.bf16.mxu1 %v1732_v28  ;;  %v1760_v27 = vpack.c.bf16 %v742_v26, %v740_v25  ;;  %v739_v28 = vld [vmem:[#allocation4 + $0x160] sm:$0xff]  ;;  %v744_v32 = vld [vmem:[#allocation4 + $0x188] sm:$0xff]  ;;  %v746_v34 = vld [vmem:[#allocation4 + $0x198] sm:$0xff] }
  0x6c   : > { %v1762_v30 = vpack.c.bf16 %v741_v29, %v739_v28  ;;  %v745_v37 = vld [vmem:[#allocation4 + $0x190] sm:$0xff]  ;;  %v748_v39 = vld [vmem:[#allocation4 + $0x1a8] sm:$0xff]  ;;  %v750_v40 = vld [vmem:[#allocation4 + $0x1b8] sm:$0xff] }
  0x6d   : > { %v749_v45 = vld [vmem:[#allocation4 + $0x1b0] sm:$0xff]  ;;  %v752_v46 = vld [vmem:[#allocation4 + $0x1c8] sm:$0xff]  ;;  %v754_v48 = vld [vmem:[#allocation4 + $0x1d8] sm:$0xff] }
  0x6e   : > { %1735 = vmatpush1.bf16.msra.mxu1 %v1734_v35  ;;  %v1764_v35 = vpack.c.bf16 %v746_v34, %v744_v32  ;;  %v1772_v51 = vpack.c.bf16 %v754_v48, %v752_v46  ;;  %v989_v8 = vld [vmem:[#allocation7 + $0x30] sm:$0xff]  ;;  %v992_v9 = vld [vmem:[#allocation7 + $0x48] sm:$0xff]  ;;  %v1011_v46 = vld [vmem:[#allocation7 + $0xe0] sm:$0xff] }
  0x6f   : > { %1737 = vmatprep.subr.bf16.mxu1 %v1736_v36  ;;  %v743_v36 = vld [vmem:[#allocation4 + $0x180] sm:$0xff]  ;;  %v997_v19 = vld [vmem:[#allocation7 + $0x70] sm:$0xff]  ;;  %v1000_v20 = vld [vmem:[#allocation7 + $0x88] sm:$0xff] }
  0x70   : > { %v1766_v38 = vpack.c.bf16 %v745_v37, %v743_v36  ;;  %v1001_v25 = vld [vmem:[#allocation7 + $0x90] sm:$0xff]  ;;  %v1004_v26 = vld [vmem:[#allocation7 + $0xa8] sm:$0xff] }
  0x71   : > { %v1005_v32 = vld [vmem:[#allocation7 + $0xb0] sm:$0xff]  ;;  %v1008_v34 = vld [vmem:[#allocation7 + $0xc8] sm:$0xff] }
  0x72   : > { %1739 = vmatpush1.bf16.msra.mxu1 %v1738_v41  ;;  %v1768_v41 = vpack.c.bf16 %v750_v40, %v748_v39  ;;  %v1009_v39 = vld [vmem:[#allocation7 + $0xd0] sm:$0xff]  ;;  %v1012_v40 = vld [vmem:[#allocation7 + $0xe8] sm:$0xff] }
  0x73   : > { %1741 = vmatprep.subr.bf16.mxu1 %v1740_v44  ;;  %v747_v44 = vld [vmem:[#allocation4 + $0x1a0] sm:$0xff]  ;;  %v1016_v48 = vld [vmem:[#allocation7 + $0x108] sm:$0xff] }
  0x74   : > { %v1770_v47 = vpack.c.bf16 %v749_v45, %v747_v44 }
  0x76   : > { %1743 = vmatpush1.bf16.msra.mxu1 %v1742_v49  ;;  %v751_v49 = vld [vmem:[#allocation4 + $0x1c0] sm:$0xff] }
  0x77   : > { %1745 = vmatprep.subr.bf16.mxu1 %v1744_v50  ;;  %v753_v50 = vld [vmem:[#allocation4 + $0x1d0] sm:$0xff] }
  0xca   : > { %v458_v52 = vpop.permute.xlu0 %457  ;;  %v460_v53 = vpop.permute.xlu1 %459 }
  0xcb   : > { %v486_v55 = vsel %vm485_vm4, %v432_v54, %v458_v52  ;;  %v487_v59 = vsel %vm485_vm4, %v2412_v33, %v460_v53  ;;  %v1774_v52 = vpack.c.bf16 %v753_v50, %v751_v49  ;;  %v756_v53 = vld [vmem:[#allocation4 + $0x1e8] sm:$0xff]  ;;  %v758_v54 = vld [vmem:[#allocation4 + $0x1f8] sm:$0xff] }
  0xcc   : > { %v1018_v49 = vld [vmem:[#allocation7 + $0x118] sm:$0xff] }
  0xce   : > { %v474_v56 = vpop.permute.xlu0 %473  ;;  %v476_v57 = vpop.permute.xlu1 %475 }
  0xcf   : > { %v491_v58 = vsel %vm490_vm5, %v486_v55, %v474_v56  ;;  %v492_v62 = vsel %vm490_vm5, %v487_v59, %v476_v57  ;;  %v1776_v55 = vpack.c.bf16 %v758_v54, %v756_v53  ;;  %v755_v56 = vld [vmem:[#allocation4 + $0x1e0] sm:$0xff]  ;;  %v757_v57 = vld [vmem:[#allocation4 + $0x1f0] sm:$0xff]  ;;  %v760_v59 = vld [vmem:[#allocation4 + $0x208] sm:$0xff] }
  0xd0   : > { %1600 = vmatmul.mubr.msk.f32.vlgmr.msra.gmra.mrb[0].mxu0 %vm519_vm6, %v491_v58  ;;  %v1778_v58 = vpack.c.bf16 %v757_v57, %v755_v56  ;;  %v1017_v53 = vld [vmem:[#allocation7 + $0x110] sm:$0xff]  ;;  %v1020_v54 = vld [vmem:[#allocation7 + $0x128] sm:$0xff] }
  0xd1   : > { %602 = vmatprep.mubr.f32.mxu0 %v2176_v2 }
  0xd2   : > { %v462_v60 = vpop.permute.xlu0 %461  ;;  %v478_v61 = vpop.permute.xlu1 %477 }
  0xd3   : > { %v488_v31 = vsel %vm485_vm4, %v2428_v42, %v462_v60  ;;  %v723_v42 = vld [vmem:[#allocation4 + $0xe0] sm:$0xff]  ;;  %v762_v60 = vld [vmem:[#allocation4 + $0x218] sm:$0xff] }
  0xd4   : > { %1601 = vmatmul.mubr.msk.f32.gmra.mrb[2].mxu0 %vm519_vm6, %v492_v62  ;;  %v493_v63 = vsel %vm490_vm5, %v488_v31, %v478_v61  ;;  %v1746_v7 = vpack.c.bf16 %v725_v6, %v723_v42  ;;  %v1780_v61 = vpack.c.bf16 %v762_v60, %v760_v59  ;;  %v984_v62 = vld [vmem:[#allocation7 + $0x8] sm:$0xff]  ;;  %v986_v31 = vld [vmem:[#allocation7 + $0x18] sm:$0xff]  ;;  %v1021_v59 = vld [vmem:[#allocation7 + $0x130] sm:$0xff] }
  0xd5   : > { %608 = vmatprep.mubr.f32.mxu0 %v2176_v2 }
  0xd6   : > { %v464_v3 = vpop.permute.xlu0 %463  ;;  %v480_v4 = vpop.permute.xlu1 %479  ;;  %1747 = vmatpush1.bf16.msra.mxu1 %v1746_v7  ;;  %v987_v7 = vld [vmem:[#allocation7 + $0x20] sm:$0xff] }
  0xd7   : > { %v489_v33 = vsel %vm485_vm4, %v2432_v43, %v464_v3  ;;  %1749 = vmatprep.subr.bf16.mxu1 %v1748_v10  ;;  %v732_v43 = vld [vmem:[#allocation4 + $0x128] sm:$0xff]  ;;  %v1812_v3 = vpack.c.bf16 %v986_v31, %v984_v62  ;;  %v994_v10 = vld [vmem:[#allocation7 + $0x58] sm:$0xff]  ;;  %v1818_v11 = vpack.c.bf16 %v989_v8, %v987_v7 }
  0xd8   : > { %1602 = vmatmul.mubr.msk.f32.gmra.mrb[4].mxu0 %vm519_vm6, %v493_v63  ;;  %v494_v5 = vsel %vm490_vm5, %v489_v33, %v480_v4  ;;  %v1752_v15 = vpack.c.bf16 %v734_v14, %v732_v43  ;;  %v983_v63 = vld [vmem:[#allocation7] sm:$0xff]  ;;  %v985_v4 = vld [vmem:[#allocation7 + $0x10] sm:$0xff]  ;;  %v988_v33 = vld [vmem:[#allocation7 + $0x28] sm:$0xff]  ;;  %v1820_v12 = vpack.c.bf16 %v994_v10, %v992_v9 }
  0xd9   : > { %614 = vmatprep.mubr.f32.mxu0 %v2176_v2  ;;  %v1814_v42 = vpack.c.bf16 %v985_v4, %v983_v63  ;;  %1813 = vmatprep.subr.bf16.mxu0 %v1812_v3  ;;  %v993_v43 = vld [vmem:[#allocation7 + $0x50] sm:$0xff]  ;;  %v996_v14 = vld [vmem:[#allocation7 + $0x68] sm:$0xff] }
  0xda   : > { %1751 = vmatpush1.bf16.msra.mxu1 %v1750_v13  ;;  %v991_v13 = vld [vmem:[#allocation7 + $0x40] sm:$0xff] }
  0xdb   : > { %1753 = vmatprep.subr.bf16.mxu1 %v1752_v15  ;;  %1815 = vmatpush1.bf16.msra.mxu0 %v1814_v42  ;;  %v998_v15 = vld [vmem:[#allocation7 + $0x78] sm:$0xff]  ;;  %v1822_v16 = vpack.c.bf16 %v993_v43, %v991_v13 }
  0xdc   : > { %1603 = vmatmul.mubr.msk.f32.gmra.mrb[6].mxu0 %vm519_vm6, %v494_v5  ;;  %v990_v5 = vld [vmem:[#allocation7 + $0x38] sm:$0xff]  ;;  %v1824_v17 = vpack.c.bf16 %v998_v15, %v996_v14 }
  0xdd   : > { %v1816_v6 = vpack.c.bf16 %v990_v5, %v988_v33 }
  0xde   : > { %1755 = vmatpush1.bf16.msra.mxu1 %v1754_v18  ;;  %v995_v18 = vld [vmem:[#allocation7 + $0x60] sm:$0xff] }
  0xdf   : > { %1757 = vmatprep.subr.bf16.mxu1 %v1756_v21  ;;  %1817 = vmatprep.subr.bf16.mxu0 %v1816_v6  ;;  %v1002_v21 = vld [vmem:[#allocation7 + $0x98] sm:$0xff]  ;;  %v1826_v22 = vpack.c.bf16 %v997_v19, %v995_v18 }
  0xe0   : > { %1819 = vmatpush1.bf16.msra.mxu0 %v1818_v11  ;;  %v1828_v23 = vpack.c.bf16 %v1002_v21, %v1000_v20  ;;  %v1604_v20 = vld [vmem:[%s2801_s2] ss:$0 sm:$0xff] }
  0xe1   : > { %1821 = vmatprep.subr.bf16.mxu0 %v1820_v12 }
  0xe2   : > { %1759 = vmatpush1.bf16.msra.mxu1 %v1758_v24  ;;  %v999_v24 = vld [vmem:[#allocation7 + $0x80] sm:$0xff] }
  0xe3   : > { %1761 = vmatprep.subr.bf16.mxu1 %v1760_v27  ;;  %v1006_v27 = vld [vmem:[#allocation7 + $0xb8] sm:$0xff]  ;;  %v1830_v28 = vpack.c.bf16 %v1001_v25, %v999_v24 }
  0xe4   : > { %1823 = vmatpush1.bf16.msra.mxu0 %v1822_v16  ;;  %v1832_v29 = vpack.c.bf16 %v1006_v27, %v1004_v26  ;;  %v659_v26 = vand.u32 15, %v2353_v1  ;;  %v759_v27 = vld [vmem:[#allocation4 + $0x200] sm:$0xff] }
  0xe5   : > { %1825 = vmatprep.subr.bf16.mxu0 %v1824_v17 }
  0xe6   : > { %1763 = vmatpush1.bf16.msra.mxu1 %v1762_v30  ;;  %v1003_v30 = vld [vmem:[#allocation7 + $0xa0] sm:$0xff]  ;;  %vm1618_vm7 = vcmp.ne.s32.totalorder %v659_v26, 0 }
  0xe7   : > { %1765 = vmatprep.subr.bf16.mxu1 %v1764_v35  ;;  %v1010_v35 = vld [vmem:[#allocation7 + $0xd8] sm:$0xff]  ;;  %v1834_v36 = vpack.c.bf16 %v1005_v32, %v1003_v30  ;;  %v764_v30 = vld [vmem:[#allocation4 + $0x228] sm:$0xff]  ;;  %v1023_v26 = vld [vmem:[#allocation7 + $0x140] sm:$0xff] }
  0xe8   : > { %1827 = vmatpush1.bf16.msra.mxu0 %v1826_v22  ;;  %v1836_v37 = vpack.c.bf16 %v1010_v35, %v1008_v34  ;;  %v766_v32 = vld [vmem:[#allocation4 + $0x238] sm:$0xff] }
  0xe9   : > { %1829 = vmatprep.subr.bf16.mxu0 %v1828_v23 }
  0xea   : > { %1767 = vmatpush1.bf16.msra.mxu1 %v1766_v38  ;;  %v1007_v38 = vld [vmem:[#allocation7 + $0xc0] sm:$0xff] }
  0xeb   : > { %1769 = vmatprep.subr.bf16.mxu1 %v1768_v41  ;;  %v1014_v41 = vld [vmem:[#allocation7 + $0xf8] sm:$0xff]  ;;  %v1838_v44 = vpack.c.bf16 %v1009_v39, %v1007_v38  ;;  %v763_v38 = vld [vmem:[#allocation4 + $0x220] sm:$0xff]  ;;  %v765_v39 = vld [vmem:[#allocation4 + $0x230] sm:$0xff] }
  0xec   : > { %1831 = vmatpush1.bf16.msra.mxu0 %v1830_v28  ;;  %v1840_v45 = vpack.c.bf16 %v1014_v41, %v1012_v40  ;;  %v761_v28 = vld [vmem:[#allocation4 + $0x210] sm:$0xff]  ;;  %v768_v41 = vld [vmem:[#allocation4 + $0x248] sm:$0xff] }
  0xed   : > { %1833 = vmatprep.subr.bf16.mxu0 %v1832_v29 }
  0xee   : > { %1771 = vmatpush1.bf16.msra.mxu1 %v1770_v47  ;;  %v1013_v47 = vld [vmem:[#allocation7 + $0xf0] sm:$0xff] }
  0xef   : > { %1773 = vmatprep.subr.bf16.mxu1 %v1772_v51  ;;  %v1842_v50 = vpack.c.bf16 %v1013_v47, %v1011_v46  ;;  %v1844_v51 = vpack.c.bf16 %v1018_v49, %v1016_v48  ;;  %v767_v47 = vld [vmem:[#allocation4 + $0x240] sm:$0xff]  ;;  %v769_v48 = vld [vmem:[#allocation4 + $0x250] sm:$0xff] }
  0xf0   : > { %1835 = vmatpush1.bf16.msra.mxu0 %v1834_v36  ;;  %v1782_v36 = vpack.c.bf16 %v761_v28, %v759_v27  ;;  %v1025_v27 = vld [vmem:[#allocation7 + $0x150] sm:$0xff] }
  0xf1   : > { %1837 = vmatprep.subr.bf16.mxu0 %v1836_v37  ;;  %v1784_v37 = vpack.c.bf16 %v766_v32, %v764_v30  ;;  %v1854_v28 = vpack.c.bf16 %v1025_v27, %v1023_v26  ;;  %v1027_v32 = vld [vmem:[#allocation7 + $0x160] sm:$0xff]  ;;  %v1053_v26 = vld [vmem:[#allocation7 + $0x230] sm:$0xff]  ;;  %v1056_v27 = vld [vmem:[#allocation7 + $0x248] sm:$0xff] }
  0xf2   : > { %1775 = vmatpush1.bf16.msra.mxu1 %v1774_v52  ;;  %v1015_v52 = vld [vmem:[#allocation7 + $0x100] sm:$0xff] }
  0xf3   : > { %1777 = vmatprep.subr.bf16.mxu1 %v1776_v55  ;;  %v1022_v55 = vld [vmem:[#allocation7 + $0x138] sm:$0xff]  ;;  %v1846_v56 = vpack.c.bf16 %v1017_v53, %v1015_v52  ;;  %v1790_v52 = vpack.c.bf16 %v769_v48, %v767_v47  ;;  %v1035_v47 = vld [vmem:[#allocation7 + $0x1a0] sm:$0xff]  ;;  %v1037_v48 = vld [vmem:[#allocation7 + $0x1b0] sm:$0xff] }
  0xf4   : > { %1839 = vmatpush1.bf16.msra.mxu0 %v1838_v44  ;;  %v1848_v57 = vpack.c.bf16 %v1022_v55, %v1020_v54  ;;  %v770_v44 = vld [vmem:[#allocation4 + $0x258] sm:$0xff]  ;;  %v771_v54 = vld [vmem:[#allocation4 + $0x260] sm:$0xff]  ;;  %v773_v55 = vld [vmem:[#allocation4 + $0x270] sm:$0xff] }
  0xf5   : > { %1841 = vmatprep.subr.bf16.mxu0 %v1840_v45  ;;  %v1786_v45 = vpack.c.bf16 %v765_v39, %v763_v38  ;;  %v1788_v46 = vpack.c.bf16 %v770_v44, %v768_v41  ;;  %v1031_v39 = vld [vmem:[#allocation7 + $0x180] sm:$0xff]  ;;  %v1036_v44 = vld [vmem:[#allocation7 + $0x1a8] sm:$0xff] }
  0xf6   : > { %1779 = vmatpush1.bf16.msra.mxu1 %v1778_v58  ;;  %v1019_v58 = vld [vmem:[#allocation7 + $0x120] sm:$0xff] }
  0xf7   : > { %1781 = vmatprep.subr.bf16.mxu1 %v1780_v61  ;;  %v1850_v60 = vpack.c.bf16 %v1021_v59, %v1019_v58  ;;  %v1794_v58 = vpack.c.bf16 %v773_v55, %v771_v54  ;;  %v1041_v54 = vld [vmem:[#allocation7 + $0x1d0] sm:$0xff]  ;;  %v1044_v55 = vld [vmem:[#allocation7 + $0x1e8] sm:$0xff] }
  0xf8   : > { %1843 = vmatpush1.bf16.msra.mxu0 %v1842_v50  ;;  %v772_v50 = vld [vmem:[#allocation4 + $0x268] sm:$0xff] }
  0xf9   : > { %1845 = vmatprep.subr.bf16.mxu0 %v1844_v51  ;;  %v774_v51 = vld [vmem:[#allocation4 + $0x278] sm:$0xff] }
  0xfa   : > { %v1792_v53 = vpack.c.bf16 %v774_v51, %v772_v50  ;;  %v1040_v50 = vld [vmem:[#allocation7 + $0x1c8] sm:$0xff]  ;;  %v1042_v51 = vld [vmem:[#allocation7 + $0x1d8] sm:$0xff] }
  0xfc   : > { %1847 = vmatpush1.bf16.msra.mxu0 %v1846_v56  ;;  %v776_v56 = vld [vmem:[#allocation4 + $0x288] sm:$0xff] }
  0xfd   : > { %1849 = vmatprep.subr.bf16.mxu0 %v1848_v57  ;;  %v778_v57 = vld [vmem:[#allocation4 + $0x298] sm:$0xff] }
  0xfe   : > { %v1796_v59 = vpack.c.bf16 %v778_v57, %v776_v56  ;;  %v1046_v56 = vld [vmem:[#allocation7 + $0x1f8] sm:$0xff] }
 0x100   : > { %1851 = vmatpush1.bf16.msra.mxu0 %v1850_v60  ;;  %v775_v60 = vld [vmem:[#allocation4 + $0x280] sm:$0xff] }
 0x1a3   : > { %v598_v61 = vpop.f32.mrb[0].mxu0 }
 0x1a4   : > { %v600_v62 = vpop.f32.mrb[1].mxu0 }
 0x1a5   : > { %v621_v31 = vmax.f32 %v598_v61, %v600_v62  ;;  %v777_v61 = vld [vmem:[#allocation4 + $0x290] sm:$0xff]  ;;  %v780_v62 = vld [vmem:[#allocation4 + $0x2a8] sm:$0xff] }
 0x1a7   : > { %v604_v63 = vpop.f32.mrb[2].mxu0  ;;  %v625_v33 = vrot.slane %v621_v31, 1 }
 0x1a8   : > { %v606_v3 = vpop.f32.mrb[3].mxu0 }
 0x1a9   : > { %v622_v4 = vmax.f32 %v604_v63, %v606_v3  ;;  %v1798_v63 = vpack.c.bf16 %v777_v61, %v775_v60  ;;  %v1045_v60 = vld [vmem:[#allocation7 + $0x1f0] sm:$0xff] }
 0x1ab   : > { %v626_v5 = vrot.slane %v622_v4, 1  ;;  %v610_v42 = vpop.f32.mrb[4].mxu0 }
 0x1ac   : > { %v612_v6 = vpop.f32.mrb[5].mxu0 }
 0x1ad   : > { %v631_v7 = vsel %vm444_vm0, %v625_v33, %v626_v5  ;;  %v623_v8 = vmax.f32 %v610_v42, %v612_v6  ;;  %v786_v42 = vld [vmem:[#allocation4 + $0x2d8] sm:$0xff] }
 0x1ae   : > { %v633_v9 = vmax.f32 %v621_v31, %v631_v7  ;;  %v782_v31 = vld [vmem:[#allocation4 + $0x2b8] sm:$0xff] }
 0x1af   : > { %v627_v10 = vrot.slane %v623_v8, 1  ;;  %v616_v11 = vpop.f32.mrb[6].mxu0  ;;  %v1800_v3 = vpack.c.bf16 %v782_v31, %v780_v62  ;;  %v1048_v62 = vld [vmem:[#allocation7 + $0x208] sm:$0xff]  ;;  %v1050_v31 = vld [vmem:[#allocation7 + $0x218] sm:$0xff] }
 0x1b0   : > { %637 = vst [vmem:[#allocation2] sm:$0xff] %v633_v9  ;;  %v618_v12 = vpop.f32.mrb[7].mxu0  ;;  %v785_v9 = vld [vmem:[#allocation4 + $0x2d0] sm:$0xff] }
 0x1b1   : > { %v630_v13 = vsel %vm444_vm0, %v626_v5, %v627_v10  ;;  %v624_v43 = vmax.f32 %v616_v11, %v618_v12  ;;  %v784_v5 = vld [vmem:[#allocation4 + $0x2c8] sm:$0xff]  ;;  %v790_v11 = vld [vmem:[#allocation4 + $0x2f8] sm:$0xff] }
 0x1b2   : > { %v634_v14 = vmax.f32 %v622_v4, %v630_v13  ;;  %v779_v4 = vld [vmem:[#allocation4 + $0x2a0] sm:$0xff]  ;;  %v1804_v7 = vpack.c.bf16 %v786_v42, %v784_v5 }
 0x1b3   : > { %v628_v15 = vrot.slane %v624_v43, 1 }
 0x1b4   : > { %638 = vst [vmem:[#allocation2 + $0x8] sm:$0xff] %v634_v14  ;;  %v789_v14 = vld [vmem:[#allocation4 + $0x2f0] sm:$0xff] }
 0x1b5   : > { %v629_v16 = vsel %vm444_vm0, %v627_v10, %v628_v15  ;;  %v632_v17 = vsel %vm444_vm0, %v628_v15, %v625_v33  ;;  %v781_v33 = vld [vmem:[#allocation4 + $0x2b0] sm:$0xff]  ;;  %v788_v10 = vld [vmem:[#allocation4 + $0x2e8] sm:$0xff] }
 0x1b6   : > { %v635_v18 = vmax.f32 %v623_v8, %v629_v16  ;;  %v636_v19 = vmax.f32 %v624_v43, %v632_v17  ;;  %v1802_v6 = vpack.c.bf16 %v781_v33, %v779_v4  ;;  %v783_v8 = vld [vmem:[#allocation4 + $0x2c0] sm:$0xff]  ;;  %v1808_v13 = vpack.c.bf16 %v790_v11, %v788_v10 }
 0x1b7   : > { %v1806_v12 = vpack.c.bf16 %v785_v9, %v783_v8  ;;  %v787_v43 = vld [vmem:[#allocation4 + $0x2e0] sm:$0xff]  ;;  %v368_v16 = vadd.s32 8, %v2353_v1 }
 0x1b8   : > { %639 = vst [vmem:[#allocation2 + $0x10] sm:$0xff] %v635_v18  ;;  %640 = vst [vmem:[#allocation2 + $0x18] sm:$0xff] %v636_v19  ;;  %v1810_v15 = vpack.c.bf16 %v789_v14, %v787_v43  ;;  %v969_v14 = vand.u32 7, %v2353_v1 }
 0x1b9   : > { %v666_v19 = vand.u32 15, %v368_v16  ;;  %v1047_v16 = vld [vmem:[#allocation7 + $0x200] sm:$0xff] }
 0x1ba   : > { %vm1620_vm9 = vcmp.ne.s32.totalorder %v969_v14, 0  ;;  %vm1621_vm10 = vcmp.ne.s32.totalorder %v969_v14, 7  ;;  %v1290_v14 = vld [vmem:[%s2806_s7 + $0x90] sm:$0xff] }
 0x1bb   : > { %v641_v21 = vld [vmem:[#allocation2] ss:$2 sm:$0xff]  ;;  %vm1619_vm8 = vcmp.ne.s32.totalorder %v666_v19, 15 }
 0x1bc   : > { %v651_v22 = vadd.f32 %v1604_v20, %v641_v21  ;;  %v1054_v19 = vld [vmem:[#allocation7 + $0x238] sm:$0xff] }
 0x1be   : > { %v2508_v23 = vmax.f32 %v651_v22, 0.0  ;;  %v1024_v22 = vld [vmem:[#allocation7 + $0x148] sm:$0xff] }
 0x1bf   : > { %v643_v24 = vld [vmem:[#allocation2 + $0x10] ss:$2 sm:$0xff] }
 0x1c0   : > { %v652_v25 = vadd.f32 %v1604_v20, %v643_v24  ;;  %855 = vmatprep.mubr.f32.mxu1 %v2508_v23  ;;  %v681_v34 = vrot.slane %v2508_v23, 7  ;;  %v689_v18 = vrot.slane %v2508_v23, 1  ;;  %v1026_v24 = vld [vmem:[#allocation7 + $0x158] sm:$0xff]  ;;  %v1028_v23 = vld [vmem:[#allocation7 + $0x168] sm:$0xff] }
 0x1c2   : > { %v2512_v29 = vmax.f32 %v652_v25, 0.0  ;;  %v1852_v25 = vpack.c.bf16 %v1026_v24, %v1024_v22 }
 0x1c4   : > { %v682_v35 = vrot.slane %v2512_v29, 7  ;;  %v690_v17 = vrot.slane %v2512_v29, 1  ;;  %1853 = vmatprep.subr.bf16.mxu0 %v1852_v25  ;;  %v1051_v25 = vld [vmem:[#allocation7 + $0x220] sm:$0xff] }
 0x1c5   : > { %1855 = vmatpush1.bf16.msra.mxu0 %v1854_v28  ;;  %v1058_v28 = vld [vmem:[#allocation7 + $0x258] sm:$0xff] }
 0x1c6   : > { %v684_v40 = vsel %vm427_vm1, %v682_v35, %v681_v34  ;;  %v683_v49 = vsel %vm427_vm1, %v681_v34, %v682_v35  ;;  %v691_v20 = vsel %vm444_vm0, %v689_v18, %v690_v17  ;;  %v692_v21 = vsel %vm444_vm0, %v690_v17, %v689_v18  ;;  %v1029_v34 = vld [vmem:[#allocation7 + $0x170] sm:$0xff]  ;;  %v1052_v18 = vld [vmem:[#allocation7 + $0x228] sm:$0xff] }
 0x1c7   : > { %1606 = vmatmul.mubr.msk.f32.vlgmr.msra.gmra.mrb[0].mxu1 %vm1618_vm7, %v684_v40  ;;  %v1858_v35 = vpack.c.bf16 %v1029_v34, %v1027_v32  ;;  %v1033_v40 = vld [vmem:[#allocation7 + $0x190] sm:$0xff]  ;;  %v1880_v24 = vpack.c.bf16 %v1054_v19, %v1052_v18  ;;  %v1060_v34 = vld [vmem:[#allocation7 + $0x268] sm:$0xff] }
 0x1c8   : > { %1783 = vmatpush1.bf16.msra.mxu1 %v1782_v36  ;;  %861 = vmatprep.mubr.f32.mxu1 %v2512_v29  ;;  %v1030_v29 = vld [vmem:[#allocation7 + $0x178] sm:$0xff]  ;;  %v1032_v36 = vld [vmem:[#allocation7 + $0x188] sm:$0xff]  ;;  %v1862_v41 = vpack.c.bf16 %v1033_v40, %v1031_v39  ;;  %v1049_v17 = vld [vmem:[#allocation7 + $0x210] sm:$0xff] }
 0x1c9   : > { %1785 = vmatprep.subr.bf16.mxu1 %v1784_v37  ;;  %v1856_v30 = vpack.c.bf16 %v1030_v29, %v1028_v23  ;;  %v1034_v37 = vld [vmem:[#allocation7 + $0x198] sm:$0xff]  ;;  %v1882_v23 = vpack.c.bf16 %v1053_v26, %v1051_v25  ;;  %v1884_v29 = vpack.c.bf16 %v1058_v28, %v1056_v27  ;;  %v1057_v32 = vld [vmem:[#allocation7 + $0x250] sm:$0xff]  ;;  %v1064_v40 = vld [vmem:[#allocation7 + $0x288] sm:$0xff] }
 0x1ca   : > { %v1860_v38 = vpack.c.bf16 %v1034_v37, %v1032_v36  ;;  %v1061_v39 = vld [vmem:[#allocation7 + $0x270] sm:$0xff]  ;;  %v1292_v26 = vld [vmem:[%s2806_s7 + $0xa0] sm:$0xff]  ;;  %v1293_v28 = vld [vmem:[%s2806_s7 + $0xa8] sm:$0xff] }
 0x1cb   : > { %862 = vmatmul.mubr.f32.gmra.mrb[2].mxu1 %v683_v49  ;;  %1857 = vmatprep.subr.bf16.mxu0 %v1856_v30  ;;  %v1866_v49 = vpack.c.bf16 %v1037_v48, %v1035_v47  ;;  %v1055_v30 = vld [vmem:[#allocation7 + $0x240] sm:$0xff]  ;;  %v1068_v47 = vld [vmem:[#allocation7 + $0x2a8] sm:$0xff]  ;;  %v1070_v48 = vld [vmem:[#allocation7 + $0x2b8] sm:$0xff] }
 0x1cc   : > { %1787 = vmatpush1.bf16.msra.mxu1 %v1786_v45  ;;  %932 = vmatprep.mubr.f32.mxu1 %v2176_v2  ;;  %v1038_v45 = vld [vmem:[#allocation7 + $0x1b8] sm:$0xff]  ;;  %v1886_v36 = vpack.c.bf16 %v1057_v32, %v1055_v30  ;;  %v1274_v19 = vld [vmem:[%s2806_s7 + $0x10] sm:$0xff]  ;;  %v1916_v30 = vpack.c.bf16 %v1293_v28, %v1292_v26 }
 0x1cd   : > { %1789 = vmatprep.subr.bf16.mxu1 %v1788_v46  ;;  %1859 = vmatpush1.bf16.msra.mxu0 %v1858_v35  ;;  %v1864_v46 = vpack.c.bf16 %v1038_v45, %v1036_v44  ;;  %v1062_v35 = vld [vmem:[#allocation7 + $0x278] sm:$0xff] }
 0x1ce   : > { %1861 = vmatprep.subr.bf16.mxu0 %v1860_v38  ;;  %v1888_v37 = vpack.c.bf16 %v1062_v35, %v1060_v34  ;;  %v1059_v38 = vld [vmem:[#allocation7 + $0x260] sm:$0xff]  ;;  %v1323_v18 = vld [vmem:[%s2806_s7 + $0x198] sm:$0xff] }
 0x1cf   : > { %v1890_v44 = vpack.c.bf16 %v1061_v39, %v1059_v38  ;;  %v1307_v25 = vld [vmem:[%s2806_s7 + $0x118] sm:$0xff]  ;;  %v1276_v34 = vld [vmem:[%s2806_s7 + $0x20] sm:$0xff]  ;;  %v1277_v35 = vld [vmem:[%s2806_s7 + $0x28] sm:$0xff] }
 0x1d0   : > { %1791 = vmatpush1.bf16.msra.mxu1 %v1790_v52  ;;  %v1039_v52 = vld [vmem:[#allocation7 + $0x1c0] sm:$0xff]  ;;  %v1294_v39 = vld [vmem:[%s2806_s7 + $0xb0] sm:$0xff]  ;;  %v1335_v26 = vld [vmem:[%s2806_s7 + $0x1f8] sm:$0xff] }
 0x1d1   : > { %1793 = vmatprep.subr.bf16.mxu1 %v1792_v53  ;;  %1863 = vmatpush1.bf16.msra.mxu0 %v1862_v41  ;;  %v1868_v53 = vpack.c.bf16 %v1042_v51, %v1040_v50  ;;  %v1870_v57 = vpack.c.bf16 %v1041_v54, %v1039_v52  ;;  %v1066_v41 = vld [vmem:[#allocation7 + $0x298] sm:$0xff]  ;;  %v1896_v50 = vpack.c.bf16 %v1070_v48, %v1068_v47  ;;  %v1067_v51 = vld [vmem:[#allocation7 + $0x2a0] sm:$0xff]  ;;  %v1069_v52 = vld [vmem:[#allocation7 + $0x2b0] sm:$0xff] }
 0x1d2   : > { %1865 = vmatprep.subr.bf16.mxu0 %v1864_v46  ;;  %v1892_v45 = vpack.c.bf16 %v1066_v41, %v1064_v40  ;;  %v1063_v46 = vld [vmem:[#allocation7 + $0x280] sm:$0xff]  ;;  %v1074_v54 = vld [vmem:[#allocation7 + $0x2d8] sm:$0xff] }
 0x1d3   : > { %v1309_v38 = vld [vmem:[%s2806_s7 + $0x128] sm:$0xff]  ;;  %v1295_v40 = vld [vmem:[%s2806_s7 + $0xb8] sm:$0xff] }
 0x1d4   : > { %1795 = vmatpush1.bf16.msra.mxu1 %v1794_v58  ;;  %v1872_v58 = vpack.c.bf16 %v1046_v56, %v1044_v55  ;;  %v1898_v55 = vpack.c.bf16 %v1069_v52, %v1067_v51  ;;  %v1279_v48 = vld [vmem:[%s2806_s7 + $0x38] sm:$0xff]  ;;  %v1296_v52 = vld [vmem:[%s2806_s7 + $0xc0] sm:$0xff] }
 0x1d5   : > { %1797 = vmatprep.subr.bf16.mxu1 %v1796_v59  ;;  %1867 = vmatpush1.bf16.msra.mxu0 %v1866_v49  ;;  %v1043_v59 = vld [vmem:[#allocation7 + $0x1e0] sm:$0xff] }
 0x1d6   : > { %1869 = vmatprep.subr.bf16.mxu0 %v1868_v53  ;;  %v1874_v61 = vpack.c.bf16 %v1045_v60, %v1043_v59  ;;  %v1072_v53 = vld [vmem:[#allocation7 + $0x2c8] sm:$0xff]  ;;  %v1078_v60 = vld [vmem:[#allocation7 + $0x2f8] sm:$0xff] }
 0x1d7   : > { %v1900_v56 = vpack.c.bf16 %v1074_v54, %v1072_v53  ;;  %v1076_v59 = vld [vmem:[#allocation7 + $0x2e8] sm:$0xff]  ;;  %v1328_v54 = vld [vmem:[%s2806_s7 + $0x1c0] sm:$0xff] }
 0x1d8   : > { %1799 = vmatpush1.bf16.msra.mxu1 %v1798_v63  ;;  %v1876_v63 = vpack.c.bf16 %v1050_v31, %v1048_v62  ;;  %v1904_v62 = vpack.c.bf16 %v1078_v60, %v1076_v59  ;;  %v1075_v31 = vld [vmem:[#allocation7 + $0x2e0] sm:$0xff] }
 0x1d9   : > { %1801 = vmatprep.subr.bf16.mxu1 %v1800_v3  ;;  %1871 = vmatpush1.bf16.msra.mxu0 %v1870_v57  ;;  %v1071_v57 = vld [vmem:[#allocation7 + $0x2c0] sm:$0xff] }
 0x1da   : > { %1873 = vmatprep.subr.bf16.mxu0 %v1872_v58  ;;  %v1073_v58 = vld [vmem:[#allocation7 + $0x2d0] sm:$0xff]  ;;  %v1297_v53 = vld [vmem:[%s2806_s7 + $0xc8] sm:$0xff] }
 0x1db   : > { %v1281_v59 = vld [vmem:[%s2806_s7 + $0x48] sm:$0xff] }
 0x1dc   : > { %1803 = vmatpush1.bf16.msra.mxu1 %v1802_v6 }
 0x1dd   : > { %1805 = vmatprep.subr.bf16.mxu1 %v1804_v7  ;;  %1875 = vmatpush1.bf16.msra.mxu0 %v1874_v61  ;;  %v1902_v61 = vpack.c.bf16 %v1073_v58, %v1071_v57  ;;  %v1329_v57 = vld [vmem:[%s2806_s7 + $0x1c8] sm:$0xff]  ;;  %v1280_v58 = vld [vmem:[%s2806_s7 + $0x40] sm:$0xff] }
 0x1de   : > { %1877 = vmatprep.subr.bf16.mxu0 %v1876_v63  ;;  %v1077_v63 = vld [vmem:[#allocation7 + $0x2f0] sm:$0xff]  ;;  %v1956_v60 = vpack.c.bf16 %v1329_v57, %v1328_v54 }
 0x1e0   : > { %1807 = vmatpush1.bf16.msra.mxu1 %v1806_v12 }
 0x1e1   : > { %1809 = vmatprep.subr.bf16.mxu1 %v1808_v13  ;;  %v1609_v13 = vld [vmem:[%s2803_s4] ss:$0 sm:$0xff] }
 0x1e4   : > { %1811 = vmatpush1.bf16.msra.mxu1 %v1810_v15 }
 0x1e7   : > { %933 = vmatmul.mubr.f32.vlgmr.msra.gmra.mrb[0].mxu1 %v691_v20 }
 0x1e8   : > { %938 = vmatprep.mubr.f32.mxu1 %v2176_v2 }
 0x1eb   : > { %1608 = vmatmul.mubr.msk.f32.gmra.mrb[2].mxu1 %vm1619_vm8, %v692_v21  ;;  %v1878_v21 = vpack.c.bf16 %v1049_v17, %v1047_v16  ;;  %v1322_v16 = vld [vmem:[%s2806_s7 + $0x190] sm:$0xff] }
 0x2ba   : > { %v934_v3 = vpop.f32.mrb[0].mxu1 }
 0x2bb   : > { %v936_v4 = vpop.f32.mrb[1].mxu1 }
 0x2bc   : > { %v945_v33 = vmax.f32 %v934_v3, %v936_v4  ;;  %v1906_v3 = vpack.c.bf16 %v1077_v63, %v1075_v31  ;;  %v1298_v31 = vld [vmem:[%s2806_s7 + $0xd0] sm:$0xff]  ;;  %v1299_v63 = vld [vmem:[%s2806_s7 + $0xd8] sm:$0xff] }
 0x2be   : > { %v940_v5 = vpop.f32.mrb[2].mxu1  ;;  %v947_v7 = vrot.slane %v945_v33, 1 }
 0x2bf   : > { %v942_v42 = vpop.f32.mrb[3].mxu1 }
 0x2c0   : > { %v946_v6 = vmax.f32 %v940_v5, %v942_v42  ;;  %v1289_v5 = vld [vmem:[%s2806_s7 + $0x88] sm:$0xff]  ;;  %v1320_v42 = vld [vmem:[%s2806_s7 + $0x180] sm:$0xff] }
 0x2c2   : > { %v948_v8 = vrot.slane %v946_v6, 1 }
 0x2c4   : > { %v949_v9 = vsel %vm444_vm0, %v947_v7, %v948_v8  ;;  %v950_v10 = vsel %vm444_vm0, %v948_v8, %v947_v7  ;;  %v1321_v7 = vld [vmem:[%s2806_s7 + $0x188] sm:$0xff]  ;;  %v1272_v8 = vld [vmem:[%s2806_s7] sm:$0xff] }
 0x2c5   : > { %v951_v11 = vmax.f32 %v945_v33, %v949_v9  ;;  %v952_v12 = vmax.f32 %v946_v6, %v950_v10  ;;  %v1288_v33 = vld [vmem:[%s2806_s7 + $0x80] sm:$0xff]  ;;  %v1273_v9 = vld [vmem:[%s2806_s7 + $0x8] sm:$0xff]  ;;  %v1940_v10 = vpack.c.bf16 %v1321_v7, %v1320_v42  ;;  %v1928_v42 = vpack.c.bf16 %v1299_v63, %v1298_v31  ;;  %v1283_v7 = vld [vmem:[%s2806_s7 + $0x58] sm:$0xff] }
 0x2c6   : > { %v1908_v6 = vpack.c.bf16 %v1289_v5, %v1288_v33  ;;  %v1926_v33 = vpack.c.bf16 %v1281_v59, %v1280_v58  ;;  %v1344_v58 = vsub.s32 1, %v2353_v1  ;;  %v1352_v59 = vsub.s32 3, %v2353_v1 }
 0x2c7   : > { %953 = vst [vmem:[#allocation2] sm:$0xff] %v951_v11  ;;  %954 = vst [vmem:[#allocation2 + $0x8] sm:$0xff] %v952_v12  ;;  %v1910_v11 = vpack.c.bf16 %v1273_v9, %v1272_v8  ;;  %v1304_v12 = vld [vmem:[%s2806_s7 + $0x100] sm:$0xff]  ;;  %v1314_v8 = vld [vmem:[%s2806_s7 + $0x150] sm:$0xff] }
 0x2c8   : > { %1909 = vmatprep.subr.bf16.mxu1 %v1908_v6  ;;  %v1282_v6 = vld [vmem:[%s2806_s7 + $0x50] sm:$0xff] }
 0x2c9   : > { %1911 = vmatpush3.bf16.msra.mxu1 %v1910_v11  ;;  %v1300_v11 = vld [vmem:[%s2806_s7 + $0xe0] sm:$0xff] }
 0x2ce   : > { %v955_v43 = vld [vmem:[#allocation2] ss:$2 sm:$0xff] }
 0x2cf   : > { %v963_v15 = vadd.f32 %v1609_v13, %v955_v43  ;;  %v1305_v13 = vld [vmem:[%s2806_s7 + $0x108] sm:$0xff] }
 0x2d0   : > { %v1942_v43 = vpack.c.bf16 %v1305_v13, %v1304_v12  ;;  %v1301_v12 = vld [vmem:[%s2806_s7 + $0xe8] sm:$0xff]  ;;  %v1332_v13 = vld [vmem:[%s2806_s7 + $0x1e0] sm:$0xff] }
 0x2d1   : > { %v2538_v20 = vmax.f32 %v963_v15, 0.0  ;;  %v1291_v15 = vld [vmem:[%s2806_s7 + $0x98] sm:$0xff] }
 0x2d2   : > { %v1912_v17 = vpack.c.bf16 %v1291_v15, %v1290_v14  ;;  %v1930_v14 = vpack.c.bf16 %v1283_v7, %v1282_v6 }
 0x2d3   : > { %v978_v22 = vrot.slane %v2538_v20, 7  ;;  %1143 = vmatprep.mubr.f32.mxu0 %v2538_v20  ;;  %v981_v4 = vrot.slane %v2538_v20, 1  ;;  %v1275_v20 = vld [vmem:[%s2806_s7 + $0x18] sm:$0xff] }
 0x2d4   : > { %1913 = vmatprep.subr.bf16.mxu1 %v1912_v17  ;;  %v1284_v17 = vld [vmem:[%s2806_s7 + $0x60] sm:$0xff] }
 0x2d5   : > { %1611 = vmatmul.mubr.msk.f32.vlgmr.msra.gmra.mrb[8].mxu0 %vm1620_vm9, %v978_v22  ;;  %v1914_v22 = vpack.c.bf16 %v1275_v20, %v1274_v19  ;;  %v1316_v19 = vld [vmem:[%s2806_s7 + $0x160] sm:$0xff] }
 0x2d6   : > { %1879 = vmatpush1.bf16.msra.mxu0 %v1878_v21  ;;  %1214 = vmatprep.mubr.f32.mxu0 %v2176_v2  ;;  %v1065_v2 = vld [vmem:[#allocation7 + $0x290] sm:$0xff]  ;;  %v1944_v21 = vpack.c.bf16 %v1323_v18, %v1322_v16  ;;  %v1932_v16 = vpack.c.bf16 %v1301_v12, %v1300_v11  ;;  %v1285_v18 = vld [vmem:[%s2806_s7 + $0x68] sm:$0xff] }
 0x2d7   : > { %1881 = vmatprep.subr.bf16.mxu0 %v1880_v24  ;;  %v1894_v49 = vpack.c.bf16 %v1065_v2, %v1063_v46  ;;  %v1306_v24 = vld [vmem:[%s2806_s7 + $0x110] sm:$0xff]  ;;  %1915 = vmatpush3.bf16.msra.mxu1 %v1914_v22  ;;  %v1327_v46 = vld [vmem:[%s2806_s7 + $0x1b8] sm:$0xff] }
 0x2d8   : > { %v1946_v27 = vpack.c.bf16 %v1307_v25, %v1306_v24  ;;  %1917 = vmatprep.subr.bf16.mxu1 %v1916_v30  ;;  %v1278_v2 = vld [vmem:[%s2806_s7 + $0x30] sm:$0xff]  ;;  %v1303_v24 = vld [vmem:[%s2806_s7 + $0xf8] sm:$0xff] }
 0x2d9   : > { %v1922_v51 = vpack.c.bf16 %v1279_v48, %v1278_v2  ;;  %v1302_v22 = vld [vmem:[%s2806_s7 + $0xf0] sm:$0xff]  ;;  %v1287_v30 = vld [vmem:[%s2806_s7 + $0x78] sm:$0xff] }
 0x2da   : > { %1883 = vmatpush1.bf16.msra.mxu0 %v1882_v23  ;;  %v1324_v23 = vld [vmem:[%s2806_s7 + $0x1a0] sm:$0xff]  ;;  %v1334_v25 = vld [vmem:[%s2806_s7 + $0x1f0] sm:$0xff] }
 0x2db   : > { %1885 = vmatprep.subr.bf16.mxu0 %v1884_v29  ;;  %v1325_v29 = vld [vmem:[%s2806_s7 + $0x1a8] sm:$0xff] }
 0x2dc   : > { %v1948_v32 = vpack.c.bf16 %v1325_v29, %v1324_v23  ;;  %v1936_v23 = vpack.c.bf16 %v1303_v24, %v1302_v22  ;;  %v1286_v29 = vld [vmem:[%s2806_s7 + $0x70] sm:$0xff] }
 0x2de   : > { %1887 = vmatpush1.bf16.msra.mxu0 %v1886_v36  ;;  %v1308_v36 = vld [vmem:[%s2806_s7 + $0x120] sm:$0xff] }
 0x2df   : > { %1889 = vmatprep.subr.bf16.mxu0 %v1888_v37  ;;  %v1918_v37 = vpack.c.bf16 %v1277_v35, %v1276_v34  ;;  %v1950_v41 = vpack.c.bf16 %v1309_v38, %v1308_v36  ;;  %v1318_v34 = vld [vmem:[%s2806_s7 + $0x170] sm:$0xff]  ;;  %v1319_v35 = vld [vmem:[%s2806_s7 + $0x178] sm:$0xff]  ;;  %v1938_v36 = vpack.c.bf16 %v1287_v30, %v1286_v29 }
 0x2e1   : > { %1919 = vmatpush3.bf16.msra.mxu1 %v1918_v37  ;;  %v1970_v37 = vpack.c.bf16 %v1319_v35, %v1318_v34 }
 0x2e2   : > { %1891 = vmatpush1.bf16.msra.mxu0 %v1890_v44  ;;  %v1920_v44 = vpack.c.bf16 %v1295_v40, %v1294_v39 }
 0x2e3   : > { %1893 = vmatprep.subr.bf16.mxu0 %v1892_v45  ;;  %v1326_v45 = vld [vmem:[%s2806_s7 + $0x1b0] sm:$0xff] }
 0x2e4   : > { %v1952_v47 = vpack.c.bf16 %v1327_v46, %v1326_v45  ;;  %1921 = vmatprep.subr.bf16.mxu1 %v1920_v44  ;;  %v2179_v45 = vmov 1966171168  }
 0x2e5   : > { %1923 = vmatpush3.bf16.msra.mxu1 %v1922_v51  ;;  %v1242_v46 = vunpack.c.l.s4 %v2179_v45 }
 0x2e6   : > { %1895 = vmatpush1.bf16.msra.mxu0 %v1894_v49  ;;  %v1310_v49 = vld [vmem:[%s2806_s7 + $0x130] sm:$0xff] }
 0x2e7   : > { %1897 = vmatprep.subr.bf16.mxu0 %v1896_v50  ;;  %v1311_v50 = vld [vmem:[%s2806_s7 + $0x138] sm:$0xff]  ;;  %v1243_v2 = vunpack.c.0.s8 %v1242_v46 }
 0x2ea   : > { %1899 = vmatpush1.bf16.msra.mxu0 %v1898_v55  ;;  %v1954_v55 = vpack.c.bf16 %v1311_v50, %v1310_v49  ;;  %v1246_v50 = vsub.s32 %v1243_v2, %v2353_v1 }
 0x2eb   : > { %1901 = vmatprep.subr.bf16.mxu0 %v1900_v56  ;;  %v1924_v56 = vpack.c.bf16 %v1297_v53, %v1296_v52 }
 0x2ed   : > { %1925 = vmatprep.subr.bf16.mxu1 %v1924_v56 }
 0x2ee   : > { %1903 = vmatpush1.bf16.msra.mxu0 %v1902_v61  ;;  %v1312_v61 = vld [vmem:[%s2806_s7 + $0x140] sm:$0xff]  ;;  %1927 = vmatpush3.bf16.msra.mxu1 %v1926_v33 }
 0x2ef   : > { %1905 = vmatprep.subr.bf16.mxu0 %v1904_v62  ;;  %v1313_v62 = vld [vmem:[%s2806_s7 + $0x148] sm:$0xff]  ;;  %1929 = vmatprep.subr.bf16.mxu1 %v1928_v42 }
 0x2f0   : > { %v1958_v5 = vpack.c.bf16 %v1313_v62, %v1312_v61 }
 0x2f2   : > { %1907 = vmatpush1.bf16.msra.mxu0 %v1906_v3  ;;  %v1330_v3 = vld [vmem:[%s2806_s7 + $0x1d0] sm:$0xff]  ;;  %1931 = vmatpush3.bf16.msra.mxu1 %v1930_v14 }
 0x2f3   : > { %1941 = vmatprep.subr.bf16.mxu0 %v1940_v10  ;;  %v1315_v10 = vld [vmem:[%s2806_s7 + $0x158] sm:$0xff]  ;;  %1933 = vmatprep.subr.bf16.mxu1 %v1932_v16 }
 0x2f4   : > { %v1962_v15 = vpack.c.bf16 %v1315_v10, %v1314_v8 }
 0x2f5   : > { %1613 = vmatmul.mubr.msk.f32.vlgmr.msra.gmra.mrb[8].mxu0 %vm1621_vm10, %v981_v4  ;;  %v1331_v4 = vld [vmem:[%s2806_s7 + $0x1d8] sm:$0xff] }
 0x2f6   : > { %1943 = vmatpush3.bf16.msra.mxu0 %v1942_v43  ;;  %v1960_v9 = vpack.c.bf16 %v1331_v4, %v1330_v3  ;;  %v1333_v43 = vld [vmem:[%s2806_s7 + $0x1e8] sm:$0xff] }
 0x2f7   : > { %1945 = vmatprep.subr.bf16.mxu0 %v1944_v21  ;;  %v1964_v20 = vpack.c.bf16 %v1333_v43, %v1332_v13  ;;  %v1317_v21 = vld [vmem:[%s2806_s7 + $0x168] sm:$0xff] }
 0x2f8   : > { %v1966_v28 = vpack.c.bf16 %v1317_v21, %v1316_v19 }
 0x2fa   : > { %1947 = vmatpush3.bf16.msra.mxu0 %v1946_v27  ;;  %v1934_v27 = vpack.c.bf16 %v1285_v18, %v1284_v17 }
 0x2fb   : > { %1949 = vmatprep.subr.bf16.mxu0 %v1948_v32  ;;  %v1968_v32 = vpack.c.bf16 %v1335_v26, %v1334_v25 }
 0x2fc   : > { %1935 = vmatpush3.bf16.msra.mxu1 %v1934_v27 }
 0x2fd   : > { %1937 = vmatprep.subr.bf16.mxu1 %v1936_v23 }
 0x2fe   : > { %1951 = vmatpush3.bf16.msra.mxu0 %v1950_v41 }
 0x2ff   : > { %1953 = vmatprep.subr.bf16.mxu0 %v1952_v47  ;;  %v1614_v47 = vld [vmem:[%s2805_s6] ss:$0 sm:$0xff] }
 0x300   : > { %1939 = vmatpush3.bf16.msra.mxu1 %v1938_v36 }
 0x302   : > { %1955 = vmatpush3.bf16.msra.mxu0 %v1954_v55 }
 0x303   : > { %1957 = vmatprep.subr.bf16.mxu0 %v1956_v60  ;;  %v1340_v60 = vsub.s32 0, %v2353_v1 }
 0x306   : > { %1959 = vmatpush3.bf16.msra.mxu0 %v1958_v5  ;;  %v1336_v5 = vld [vmem:[%s2807_s8] sm:$0x1] }
 0x307   : > { %1961 = vmatprep.subr.bf16.mxu0 %v1960_v9 }
 0x30a   : > { %1963 = vmatpush3.bf16.msra.mxu0 %v1962_v15 }
 0x30b   : > { %1965 = vmatprep.subr.bf16.mxu0 %v1964_v20 }
 0x30e   : > { %1967 = vmatpush3.bf16.msra.mxu0 %v1966_v28 }
 0x30f   : > { %1969 = vmatprep.subr.bf16.mxu0 %v1968_v32 }
 0x312   : > { %1971 = vmatpush3.bf16.msra.mxu0 %v1970_v37 }
 0x3c8   : > { %v1216_v38 = vpop.f32.mrb[8].mxu0 }
 0x3c9   : > { %v1218_v39 = vpop.f32.mrb[9].mxu0 }
 0x3ca   : > { %v1221_v40 = vmax.f32 %v1216_v38, %v1218_v39 }
 0x3cc   : > { %v1222_v41 = vrot.slane %v1221_v40, 1 }
 0x3ce   : > { %v1223_v44 = vmax.f32 %v1221_v40, %v1222_v41 }
 0x3d0   : > { %1224 = vst [vmem:[#allocation2] sm:$0xff] %v1223_v44 }
 0x3d7   : > { %v1225_v48 = vld [vmem:[#allocation2] ss:$2 sm:$0xf] }
 0x3d8   : > { %v1233_v49 = vadd.f32 %v1614_v47, %v1225_v48 }
 0x3da   : > { %v1234_v51 = vmax.f32 %v1233_v49, 0.0 }
 0x3dc   : > { %1239 = vst.msk [vmem:[#allocation3] sm:$0x1] %vm1237_vm11, %v1234_v51  ;;  %v1247_v52 = vrot.slane %v1234_v51, %v1246_v50 }
 0x3de   : > { %v1248_v53 = vcombine.high %v1247_v52, %v1247_v52  ;;  %v1255_v54 = vrot.slane %v1247_v52, %v1246_v50 }
 0x3e0   : > { %v1262_v55 = vrot.slane %v1248_v53, %v1246_v50  ;;  %v1265_v56 = vcombine.high %v1255_v54, %v1255_v54 }
 0x3e2   : > { %1264 = vst.msk [vmem:[#allocation3 + $0x1] sm:$0x1] %vm1237_vm11, %v1262_v55  ;;  %1267 = vst.msk [vmem:[#allocation3 + $0x2] sm:$0x1] %vm1237_vm11, %v1265_v56  ;;  %v1268_v57 = vcombine.high %v1262_v55, %v1262_v55 }
 0x3e4   : > { %1270 = vst.msk [vmem:[#allocation3 + $0x3] sm:$0x1] %vm1237_vm11, %v1268_v57 }
 0x3eb   : > { %v1271_v61 = vld [vmem:[#allocation3] sm:$0xf] }
 0x3ec   : > { %v1345_v62 = vrot.slane %v1271_v61, %v1344_v58  ;;  %v1353_v31 = vrot.slane %v1271_v61, %v1352_v59  ;;  %v1341_v63 = vrot.slane %v1271_v61, %v1340_v60  ;;  %v1349_v3 = vrot.slane %v1271_v61, %v1348_v0 }
 0x3ee   : > { %1422 = vmatprep.mubr.f32.mxu1 %v1345_v62  ;;  %1492 = vmatprep.mubr.f32.mxu0 %v1353_v31 }
 0x3ef   : > { %1423 = vmatmul.mubr.f32.vlgmr.msra.gmra.mrb[4].mxu1 %v1341_v63  ;;  %1493 = vmatmul.mubr.f32.vlgmr.msra.gmra.mrb[10].mxu0 %v1349_v3 }
 0x4c2   : > { %v1654_v4 = vpop.f32.mrb[4].mxu1  ;;  %v1689_v33 = vpop.f32.mrb[10].mxu0 }
 0x4c3   : > { %v1655_v42 = vpop.f32.mrb[5].mxu1  ;;  %v1690_v1 = vpop.f32.mrb[11].mxu0 }
 0x4c4   : > { %v1656_v6 = vadd.f32 %v1655_v42, %v1654_v4  ;;  %v1691_v7 = vadd.f32 %v1690_v1, %v1689_v33 }
 0x4c6   : > { %v1425_v8 = vadd.f32 %v1656_v6, %v1336_v5 }
 0x4c8   : > { %v1495_v9 = vadd.f32 %v1691_v7, %v1425_v8 }
 0x4ca   : > { %1499 = vst.msk [vmem:[%s355_s21] sm:$0x1] %vm1498_vm12, %v1495_v9 }
 0x4cb   : > { %2113 = shalt.err (!%p2110_p11)
}
 0x4cc   : > { %s2114_s22 = scalar_lea.hbm %s2757_s26, 16  ;;  %s2118_s11 = scalar_lea.hbm %s2808_s9, 32 }
 0x4cd   : > { %p2115_p13 = scmp.ne.s32.totalorder %s2757_s26, %s2114_s22  ;;  %p2119_p6 = scmp.lt.u32.totalorder %s2757_s26, %s2808_s9 }
 0x4ce   : > { %p2120_p9 = scmp.lt.u32.totalorder %s2118_s11, %s2114_s22  ;;  %p2122_p12 = scmp.lt.u32.totalorder %s2114_s22, %s2757_s26 }
 0x4cf   : > { %p2116_p5 = pnand %p2115_p13, %p2829_p1 }
 0x4d0   : > { %p2121_p10 = por %p2120_p9, %p2119_p6 }
 0x4d1   : > { %p2117_p0 = pneg %p2116_p5 }
 0x4d2   : > { %p2123_p2 = por %p2122_p12, %p2121_p10 }
 0x4d4   : > { %p2124_p3 = pnand %p2123_p2, %p2117_p0 }
 0x4d6   : > { %2127 = shalt.err (!%p2124_p3)
}
 0x4d7   : > { %1986 = dma.vmem_to_hbm [thread:$0]  (%p2829_p1), %s2759_s24, 16, %s2757_s26, %s1501_s27  }
 0x4d8 PF: > { %p2003_p4 = scmp.ge.s32.totalorder %s2170_s12, 2  ;;  %s1525_s21 = sand.u32 1, %s2158_s30  }
 0x4d9   : > { %p2830_p7 = scmp.ne.s32.totalorder %s2819_s20, 0  ;;  %s1526_s28 = scalar_lea.sflag [#allocation6], %s1525_s21 }
 0x4db   : > { %p1996_p8 = pnand %p2003_p4, %p2830_p7 }
 0x4dd   : > { %2153 = dma.done.wait (!%p1996_p8), %s1526_s28, 16  }
 0x4de   : > { %2155 = vsyncadd (!%p1996_p8), %s1526_s28, 4294967280  ;;  %s2831_s12 = sld [smem:[#allocation14_spill]]  ;;  %s2832_s16 = sld [smem:[#allocation13_spill]] }
 0x4df   : > { %s2833_s11 = sld [smem:[#allocation15_spill]]  ;;  %s2834_s30 = smov %s2162_s10 }
 0x4e4   : > { %p21_p11 = scmp.ge.s32.totalorder %s2831_s12, 4   ;;  %s2835_s10 = smov %s2832_s16 }
 0x4e6   :  { %23 = sbr.rel (!%p21_p11) target bundleno = 5 (0x5), region = 101 }
 0x4ed   :  { %1530 = vsyncpa [#allocation5], 1 }
 0x4ee   :  { %1532 = vsyncpa [#allocation5 + $0x1], 1 }
 0x4ef   :  { %1533 = vsyncpa [#allocation8], 1 }
 0x4f0   :  { %1534 = vsyncpa [#allocation6], 1 }
 0x4f1   :  { %1536 = vsyncpa [#allocation6 + $0x1], 1 }

</bundles_post_ra>
